<compile_context>
chip_gen: v7x
topology: tpu7x:2x2x1
jax: 0.10.0
libtpu: 0.0.40
codegen_flags: <defaults>
</compile_context>

<pallas_src>
import jax
import jax.numpy as jnp
from jax import lax
from jax.experimental import pallas as pl
from jax.experimental.pallas import tpu as pltpu

_LOW = 75.0
_HIGH = 200.0
_TAN22 = 0.4142135623730951   # tan(22.5 deg)
_TAN67 = 2.414213562373095    # tan(67.5 deg)


def _round_up(n, m):
    return ((n + m - 1) // m) * m


def _make_canny_loss_kernel(C, H, W, Hp, Wp):
    """Builds the per-batch-item kernel; static shapes are closed over."""

    # Safety bound only: the while_loop exits at the true fixpoint (serpentine
    # weak chains can exceed the Chebyshev diameter, so don't cap below H*W).
    max_it = H * W

    def _sh(x, di, dj):
        # y[i, j] = x[i + di, j + dj] with wraparound.  Safe: the valid image
        # occupies rows 1..H, cols 1..W of the (Hp, Wp) plane and all shifts
        # are +/-1, so wraparound never reaches a valid pixel.
        y = x
        if di:
            y = pltpu.roll(y, (-di) % Hp, axis=0)
        if dj:
            y = pltpu.roll(y, (-dj) % Wp, axis=1)
        return y

    def _strong_weak(img_ref, valid):
        """Strong/weak maps (f32 {0,1}) on (Hp, Wp); zero on the pad ring."""
        best_gx = best_gy = best_mag = None
        for c in range(C):
            # torch.mul(x,255).clamp(0,255) then numpy .astype('uint8') (= floor, x>=0)
            q = jnp.floor(jnp.clip(img_ref[0, c] * 255.0, 0.0, 255.0))
            # Separable 3x3 Sobel; replicate border comes from the wrapper's
            # 1-pixel edge padding (8 rolls/channel instead of 14).
            sy = _sh(q, -1, 0) + 2.0 * q + _sh(q, 1, 0)
            sx = _sh(q, 0, -1) + 2.0 * q + _sh(q, 0, 1)
            gx = _sh(sy, 0, 1) - _sh(sy, 0, -1)
            gy = _sh(sx, 1, 0) - _sh(sx, -1, 0)
            mag = jnp.abs(gx) + jnp.abs(gy)          # L1 gradient (cv2 default)
            if best_mag is None:
                best_gx, best_gy, best_mag = gx, gy, mag
            else:
                pick = mag > best_mag                # max-magnitude channel per pixel
                best_gx = jnp.where(pick, gx, best_gx)
                best_gy = jnp.where(pick, gy, best_gy)
                best_mag = jnp.where(pick, mag, best_mag)

        # Out-of-image neighbours must read as 0: zero the pad ring once.
        m = best_mag * valid
        ax = jnp.abs(best_gx)
        ay = jnp.abs(best_gy)

        # 8 neighbour maps of m (8 rolls: diagonals reuse the axial rolls).
        mL = _sh(m, 0, -1)
        mR = _sh(m, 0, 1)
        mU = _sh(m, -1, 0)
        mD = _sh(m, 1, 0)
        mUL = _sh(mL, -1, 0)
        mDL = _sh(mL, 1, 0)
        mUR = _sh(mR, -1, 0)
        mDR = _sh(mR, 1, 0)

        # Direction-quantized non-maximum suppression (boolean masks throughout,
        # keeps live f32 temporaries low).
        horiz = ay < ax * _TAN22
        vert = ay > ax * _TAN67
        cand_h = (m > mL) & (m >= mR)
        cand_v = (m > mU) & (m >= mD)
        cand_dp = (m > mUL) & (m > mDR)
        cand_dn = (m > mUR) & (m > mDL)
        diag_neg = jnp.logical_xor(best_gx < 0, best_gy < 0)
        cand_d = (diag_neg & cand_dn) | (~diag_neg & cand_dp)
        local_max = (horiz & cand_h) | (~horiz & vert & cand_v) | (~horiz & ~vert & cand_d)

        cand = (m > _LOW) & local_max
        is_strong = cand & (m > _HIGH)
        strong = is_strong.astype(jnp.float32)
        weak = (cand & jnp.logical_not(is_strong)).astype(jnp.float32)
        # Propagation only needed if there is at least one weak AND one strong pixel.
        need = jnp.logical_and(jnp.max(weak) > 0.0, jnp.max(strong) > 0.0)
        return strong, weak, need

    def kernel(yp_ref, yt_ref, o_ref):
        # Valid-image mask (pad ring = 0); hoisted: built once per grid step.
        rows = lax.broadcasted_iota(jnp.int32, (Hp, Wp), 0)
        cols = lax.broadcasted_iota(jnp.int32, (Hp, Wp), 1)
        valid = ((rows >= 1) & (rows <= H) & (cols >= 1) & (cols <= W)).astype(jnp.float32)

        sp, wkp, need_p = _strong_weak(yp_ref, valid)
        st, wkt, need_t = _strong_weak(yt_ref, valid)

        # Hysteresis: weak pixels 8-connected (through weak) to strong become
        # edges.  Separable 3x3 dilation (4 rolls/pass); both images share one
        # while_loop (iterations = max of depths, not the sum) and each
        # iteration does 2 dilation passes per convergence check so full-plane
        # reductions / scalar syncs are halved.
        def dilate(s, weak):
            u = jnp.maximum(s, jnp.maximum(_sh(s, -1, 0), _sh(s, 1, 0)))
            d = jnp.maximum(u, jnp.maximum(_sh(u, 0, -1), _sh(u, 0, 1)))
            return jnp.maximum(s, d * weak)

        def cond(carry):
            it, _, _, changed = carry
            return jnp.logical_and(it < max_it, changed)

        def body(carry):
            it, s_p, s_t, _ = carry
            n_p = dilate(dilate(s_p, wkp), wkp)
            n_t = dilate(dilate(s_t, wkt), wkt)
            # Monotone: n >= s pointwise, so max(n - s) > 0 <=> not yet fixpoint.
            changed = jnp.maximum(jnp.max(n_p - s_p), jnp.max(n_t - s_t)) > 0.0
            return it + 1, n_p, n_t, changed

        changed0 = jnp.logical_or(need_p, need_t)
        _, ep, et, _ = lax.while_loop(cond, body, (jnp.int32(0), sp, st, changed0))

        # Canny maps are {0,255}: |(255*ep - 255*et)/255| == |ep - et|, ep/et in {0,1}.
        # The pad ring is 0 for both maps, so summing the whole plane == valid sum.
        per_image_sum = jnp.sum(jnp.abs(ep - et))
        # Lane-dense (8,128) output block -> unmasked vst; wrapper reads [b, 0, 0].
        o_ref[...] = jnp.full((1, 8, 128), per_image_sum, dtype=jnp.float32)

    return kernel


@jax.jit
def canny_edge_loss_mean(y_pred, y_true):
    y_pred = y_pred.astype(jnp.float32)
    y_true = y_true.astype(jnp.float32)
    B, C, H, W = y_pred.shape

    # Pad H,W to sublane/lane-dense shapes with a >=1 pixel edge-replicated ring.
    Hp = _round_up(H + 2, 8)
    Wp = _round_up(W + 2, 128)
    pad = ((0, 0), (0, 0), (1, Hp - H - 1), (1, Wp - W - 1))
    yp = jnp.pad(y_pred, pad, mode="edge")
    yt = jnp.pad(y_true, pad, mode="edge")

    kernel = _make_canny_loss_kernel(C, H, W, Hp, Wp)
    partials = pl.pallas_call(
        kernel,
        out_shape=jax.ShapeDtypeStruct((B, 8, 128), jnp.float32),
        grid=(B,),
        in_specs=[
            pl.BlockSpec((1, C, Hp, Wp), lambda b: (b, 0, 0, 0)),
            pl.BlockSpec((1, C, Hp, Wp), lambda b: (b, 0, 0, 0)),
        ],
        out_specs=pl.BlockSpec((1, 8, 128), lambda b: (b, 0, 0)),
        compiler_params=pltpu.CompilerParams(
            dimension_semantics=("parallel",),          # 2 TCs on v7x; harmless elsewhere
            vmem_limit_bytes=48 * 1024 * 1024,          # per-image blocks; fits v7x 64 MiB
        ),
    )(yp, yt)
    # Mean over the original B*H*W pixels (pad pixels contribute 0).
    return jnp.sum(partials[:, 0, 0]) / jnp.float32(B * H * W)


if __name__ == "__main__":
    key = jax.random.PRNGKey(0)
    k1, k2 = jax.random.split(key)
    B, C, H, W = 2, 3, 16, 16
    y_pred = jax.random.uniform(k1, (B, C, H, W), dtype=jnp.float32)
    y_true = jnp.clip(
        y_pred + 0.1 * jax.random.normal(k2, (B, C, H, W), dtype=jnp.float32), 0.0, 1.0
    )
    loss = canny_edge_loss_mean(y_pred, y_true)
    jax.block_until_ready(loss)
    print("KERNEL_OK")
</pallas_src>

<mosaic_0001>
module attributes {stable_mosaic.version = 11 : i64} {
  func.func @kernel(%arg0: i32, %arg1: memref<1x3x24x128xf32, #tpu.memory_space<vmem>>, %arg2: memref<1x3x24x128xf32, #tpu.memory_space<vmem>>, %arg3: memref<1x8x128xf32, #tpu.memory_space<vmem>>) attributes {dimension_semantics = [#tpu.dimension_semantics<parallel>], iteration_bounds = array<i64: 2>, scalar_prefetch = 0 : i64, scratch_operands = 0 : i64, tpu.core_type = #tpu.core_type<tc>, window_params = [{transform_indices = @transform_0, window_bounds = array<i64: 1, 3, 24, 128>}, {transform_indices = @transform_1, window_bounds = array<i64: 1, 3, 24, 128>}, {transform_indices = @transform_2, window_bounds = array<i64: 1, 8, 128>}]} {
    %0 = tpu.iota {dimensions = array<i32: 0>} : vector<24x128xi32>
    %1 = tpu.iota {dimensions = array<i32: 1>} : vector<24x128xi32>
    %c1_i32 = arith.constant 1 : i32
    %2 = vector.broadcast %c1_i32 : i32 to vector<24x128xi32>
    %3 = arith.cmpi sge, %0, %2 : vector<24x128xi32>
    %c16_i32 = arith.constant 16 : i32
    %4 = vector.broadcast %c16_i32 : i32 to vector<24x128xi32>
    %5 = arith.cmpi sle, %0, %4 : vector<24x128xi32>
    %6 = arith.andi %3, %5 : vector<24x128xi1>
    %c1_i32_0 = arith.constant 1 : i32
    %7 = vector.broadcast %c1_i32_0 : i32 to vector<24x128xi32>
    %8 = arith.cmpi sge, %1, %7 : vector<24x128xi32>
    %9 = arith.andi %6, %8 : vector<24x128xi1>
    %c16_i32_1 = arith.constant 16 : i32
    %10 = vector.broadcast %c16_i32_1 : i32 to vector<24x128xi32>
    %11 = arith.cmpi sle, %1, %10 : vector<24x128xi32>
    %12 = arith.andi %9, %11 : vector<24x128xi1>
    %13 = arith.extui %12 : vector<24x128xi1> to vector<24x128xi32>
    %14 = arith.sitofp %13 : vector<24x128xi32> to vector<24x128xf32>
    %c0 = arith.constant 0 : index
    %c0_2 = arith.constant 0 : index
    %c0_3 = arith.constant 0 : index
    %c0_4 = arith.constant 0 : index
    %15 = vector.load %arg1[%c0, %c0_2, %c0_3, %c0_4] : memref<1x3x24x128xf32, #tpu.memory_space<vmem>>, vector<1x1x24x128xf32>
    %16 = vector.shape_cast %15 : vector<1x1x24x128xf32> to vector<24x128xf32>
    %cst = arith.constant 2.550000e+02 : f32
    %17 = vector.broadcast %cst : f32 to vector<24x128xf32>
    %18 = arith.mulf %16, %17 : vector<24x128xf32>
    %cst_5 = arith.constant 0.000000e+00 : f32
    %cst_6 = arith.constant 2.550000e+02 : f32
    %19 = vector.broadcast %cst_5 : f32 to vector<24x128xf32>
    %20 = arith.maximumf %19, %18 : vector<24x128xf32>
    %21 = vector.broadcast %cst_6 : f32 to vector<24x128xf32>
    %22 = arith.minimumf %21, %20 : vector<24x128xf32>
    %23 = math.floor %22 : vector<24x128xf32>
    %c1_i32_7 = arith.constant 1 : i32
    %24 = tpu.dynamic_rotate %23 by %c1_i32_7 dim 0 : vector<24x128xf32>, i32 -> vector<24x128xf32>
    %cst_8 = arith.constant 2.000000e+00 : f32
    %25 = vector.broadcast %cst_8 : f32 to vector<24x128xf32>
    %26 = arith.mulf %25, %23 : vector<24x128xf32>
    %27 = arith.addf %24, %26 : vector<24x128xf32>
    %c23_i32 = arith.constant 23 : i32
    %28 = tpu.dynamic_rotate %23 by %c23_i32 dim 0 : vector<24x128xf32>, i32 -> vector<24x128xf32>
    %29 = arith.addf %27, %28 : vector<24x128xf32>
    %c1_i32_9 = arith.constant 1 : i32
    %30 = tpu.dynamic_rotate %23 by %c1_i32_9 dim 1 : vector<24x128xf32>, i32 -> vector<24x128xf32>
    %cst_10 = arith.constant 2.000000e+00 : f32
    %31 = vector.broadcast %cst_10 : f32 to vector<24x128xf32>
    %32 = arith.mulf %31, %23 : vector<24x128xf32>
    %33 = arith.addf %30, %32 : vector<24x128xf32>
    %c127_i32 = arith.constant 127 : i32
    %34 = tpu.dynamic_rotate %23 by %c127_i32 dim 1 : vector<24x128xf32>, i32 -> vector<24x128xf32>
    %35 = arith.addf %33, %34 : vector<24x128xf32>
    %c127_i32_11 = arith.constant 127 : i32
    %36 = tpu.dynamic_rotate %29 by %c127_i32_11 dim 1 : vector<24x128xf32>, i32 -> vector<24x128xf32>
    %c1_i32_12 = arith.constant 1 : i32
    %37 = tpu.dynamic_rotate %29 by %c1_i32_12 dim 1 : vector<24x128xf32>, i32 -> vector<24x128xf32>
    %38 = arith.subf %36, %37 : vector<24x128xf32>
    %c23_i32_13 = arith.constant 23 : i32
    %39 = tpu.dynamic_rotate %35 by %c23_i32_13 dim 0 : vector<24x128xf32>, i32 -> vector<24x128xf32>
    %c1_i32_14 = arith.constant 1 : i32
    %40 = tpu.dynamic_rotate %35 by %c1_i32_14 dim 0 : vector<24x128xf32>, i32 -> vector<24x128xf32>
    %41 = arith.subf %39, %40 : vector<24x128xf32>
    %42 = math.absf %38 : vector<24x128xf32>
    %43 = math.absf %41 : vector<24x128xf32>
    %44 = arith.addf %42, %43 : vector<24x128xf32>
    %c0_15 = arith.constant 0 : index
    %c1 = arith.constant 1 : index
    %c0_16 = arith.constant 0 : index
    %c0_17 = arith.constant 0 : index
    %45 = vector.load %arg1[%c0_15, %c1, %c0_16, %c0_17] : memref<1x3x24x128xf32, #tpu.memory_space<vmem>>, vector<1x1x24x128xf32>
    %46 = vector.shape_cast %45 : vector<1x1x24x128xf32> to vector<24x128xf32>
    %cst_18 = arith.constant 2.550000e+02 : f32
    %47 = vector.broadcast %cst_18 : f32 to vector<24x128xf32>
    %48 = arith.mulf %46, %47 : vector<24x128xf32>
    %cst_19 = arith.constant 0.000000e+00 : f32
    %cst_20 = arith.constant 2.550000e+02 : f32
    %49 = vector.broadcast %cst_19 : f32 to vector<24x128xf32>
    %50 = arith.maximumf %49, %48 : vector<24x128xf32>
    %51 = vector.broadcast %cst_20 : f32 to vector<24x128xf32>
    %52 = arith.minimumf %51, %50 : vector<24x128xf32>
    %53 = math.floor %52 : vector<24x128xf32>
    %c1_i32_21 = arith.constant 1 : i32
    %54 = tpu.dynamic_rotate %53 by %c1_i32_21 dim 0 : vector<24x128xf32>, i32 -> vector<24x128xf32>
    %cst_22 = arith.constant 2.000000e+00 : f32
    %55 = vector.broadcast %cst_22 : f32 to vector<24x128xf32>
    %56 = arith.mulf %55, %53 : vector<24x128xf32>
    %57 = arith.addf %54, %56 : vector<24x128xf32>
    %c23_i32_23 = arith.constant 23 : i32
    %58 = tpu.dynamic_rotate %53 by %c23_i32_23 dim 0 : vector<24x128xf32>, i32 -> vector<24x128xf32>
    %59 = arith.addf %57, %58 : vector<24x128xf32>
    %c1_i32_24 = arith.constant 1 : i32
    %60 = tpu.dynamic_rotate %53 by %c1_i32_24 dim 1 : vector<24x128xf32>, i32 -> vector<24x128xf32>
    %cst_25 = arith.constant 2.000000e+00 : f32
    %61 = vector.broadcast %cst_25 : f32 to vector<24x128xf32>
    %62 = arith.mulf %61, %53 : vector<24x128xf32>
    %63 = arith.addf %60, %62 : vector<24x128xf32>
    %c127_i32_26 = arith.constant 127 : i32
    %64 = tpu.dynamic_rotate %53 by %c127_i32_26 dim 1 : vector<24x128xf32>, i32 -> vector<24x128xf32>
    %65 = arith.addf %63, %64 : vector<24x128xf32>
    %c127_i32_27 = arith.constant 127 : i32
    %66 = tpu.dynamic_rotate %59 by %c127_i32_27 dim 1 : vector<24x128xf32>, i32 -> vector<24x128xf32>
    %c1_i32_28 = arith.constant 1 : i32
    %67 = tpu.dynamic_rotate %59 by %c1_i32_28 dim 1 : vector<24x128xf32>, i32 -> vector<24x128xf32>
    %68 = arith.subf %66, %67 : vector<24x128xf32>
    %c23_i32_29 = arith.constant 23 : i32
    %69 = tpu.dynamic_rotate %65 by %c23_i32_29 dim 0 : vector<24x128xf32>, i32 -> vector<24x128xf32>
    %c1_i32_30 = arith.constant 1 : i32
    %70 = tpu.dynamic_rotate %65 by %c1_i32_30 dim 0 : vector<24x128xf32>, i32 -> vector<24x128xf32>
    %71 = arith.subf %69, %70 : vector<24x128xf32>
    %72 = math.absf %68 : vector<24x128xf32>
    %73 = math.absf %71 : vector<24x128xf32>
    %74 = arith.addf %72, %73 : vector<24x128xf32>
    %75 = arith.cmpf ogt, %74, %44 : vector<24x128xf32>
    %76 = arith.select %75, %68, %38 : vector<24x128xi1>, vector<24x128xf32>
    %77 = arith.select %75, %71, %41 : vector<24x128xi1>, vector<24x128xf32>
    %78 = arith.select %75, %74, %44 : vector<24x128xi1>, vector<24x128xf32>
    %c0_31 = arith.constant 0 : index
    %c2 = arith.constant 2 : index
    %c0_32 = arith.constant 0 : index
    %c0_33 = arith.constant 0 : index
    %79 = vector.load %arg1[%c0_31, %c2, %c0_32, %c0_33] : memref<1x3x24x128xf32, #tpu.memory_space<vmem>>, vector<1x1x24x128xf32>
    %80 = vector.shape_cast %79 : vector<1x1x24x128xf32> to vector<24x128xf32>
    %cst_34 = arith.constant 2.550000e+02 : f32
    %81 = vector.broadcast %cst_34 : f32 to vector<24x128xf32>
    %82 = arith.mulf %80, %81 : vector<24x128xf32>
    %cst_35 = arith.constant 0.000000e+00 : f32
    %cst_36 = arith.constant 2.550000e+02 : f32
    %83 = vector.broadcast %cst_35 : f32 to vector<24x128xf32>
    %84 = arith.maximumf %83, %82 : vector<24x128xf32>
    %85 = vector.broadcast %cst_36 : f32 to vector<24x128xf32>
    %86 = arith.minimumf %85, %84 : vector<24x128xf32>
    %87 = math.floor %86 : vector<24x128xf32>
    %c1_i32_37 = arith.constant 1 : i32
    %88 = tpu.dynamic_rotate %87 by %c1_i32_37 dim 0 : vector<24x128xf32>, i32 -> vector<24x128xf32>
    %cst_38 = arith.constant 2.000000e+00 : f32
    %89 = vector.broadcast %cst_38 : f32 to vector<24x128xf32>
    %90 = arith.mulf %89, %87 : vector<24x128xf32>
    %91 = arith.addf %88, %90 : vector<24x128xf32>
    %c23_i32_39 = arith.constant 23 : i32
    %92 = tpu.dynamic_rotate %87 by %c23_i32_39 dim 0 : vector<24x128xf32>, i32 -> vector<24x128xf32>
    %93 = arith.addf %91, %92 : vector<24x128xf32>
    %c1_i32_40 = arith.constant 1 : i32
    %94 = tpu.dynamic_rotate %87 by %c1_i32_40 dim 1 : vector<24x128xf32>, i32 -> vector<24x128xf32>
    %cst_41 = arith.constant 2.000000e+00 : f32
    %95 = vector.broadcast %cst_41 : f32 to vector<24x128xf32>
    %96 = arith.mulf %95, %87 : vector<24x128xf32>
    %97 = arith.addf %94, %96 : vector<24x128xf32>
    %c127_i32_42 = arith.constant 127 : i32
    %98 = tpu.dynamic_rotate %87 by %c127_i32_42 dim 1 : vector<24x128xf32>, i32 -> vector<24x128xf32>
    %99 = arith.addf %97, %98 : vector<24x128xf32>
    %c127_i32_43 = arith.constant 127 : i32
    %100 = tpu.dynamic_rotate %93 by %c127_i32_43 dim 1 : vector<24x128xf32>, i32 -> vector<24x128xf32>
    %c1_i32_44 = arith.constant 1 : i32
    %101 = tpu.dynamic_rotate %93 by %c1_i32_44 dim 1 : vector<24x128xf32>, i32 -> vector<24x128xf32>
    %102 = arith.subf %100, %101 : vector<24x128xf32>
    %c23_i32_45 = arith.constant 23 : i32
    %103 = tpu.dynamic_rotate %99 by %c23_i32_45 dim 0 : vector<24x128xf32>, i32 -> vector<24x128xf32>
    %c1_i32_46 = arith.constant 1 : i32
    %104 = tpu.dynamic_rotate %99 by %c1_i32_46 dim 0 : vector<24x128xf32>, i32 -> vector<24x128xf32>
    %105 = arith.subf %103, %104 : vector<24x128xf32>
    %106 = math.absf %102 : vector<24x128xf32>
    %107 = math.absf %105 : vector<24x128xf32>
    %108 = arith.addf %106, %107 : vector<24x128xf32>
    %109 = arith.cmpf ogt, %108, %78 : vector<24x128xf32>
    %110 = arith.select %109, %102, %76 : vector<24x128xi1>, vector<24x128xf32>
    %111 = arith.select %109, %105, %77 : vector<24x128xi1>, vector<24x128xf32>
    %112 = arith.select %109, %108, %78 : vector<24x128xi1>, vector<24x128xf32>
    %113 = arith.mulf %112, %14 : vector<24x128xf32>
    %114 = math.absf %110 : vector<24x128xf32>
    %115 = math.absf %111 : vector<24x128xf32>
    %c1_i32_47 = arith.constant 1 : i32
    %116 = tpu.dynamic_rotate %113 by %c1_i32_47 dim 1 : vector<24x128xf32>, i32 -> vector<24x128xf32>
    %c127_i32_48 = arith.constant 127 : i32
    %117 = tpu.dynamic_rotate %113 by %c127_i32_48 dim 1 : vector<24x128xf32>, i32 -> vector<24x128xf32>
    %c1_i32_49 = arith.constant 1 : i32
    %118 = tpu.dynamic_rotate %113 by %c1_i32_49 dim 0 : vector<24x128xf32>, i32 -> vector<24x128xf32>
    %c23_i32_50 = arith.constant 23 : i32
    %119 = tpu.dynamic_rotate %113 by %c23_i32_50 dim 0 : vector<24x128xf32>, i32 -> vector<24x128xf32>
    %c1_i32_51 = arith.constant 1 : i32
    %120 = tpu.dynamic_rotate %116 by %c1_i32_51 dim 0 : vector<24x128xf32>, i32 -> vector<24x128xf32>
    %c23_i32_52 = arith.constant 23 : i32
    %121 = tpu.dynamic_rotate %116 by %c23_i32_52 dim 0 : vector<24x128xf32>, i32 -> vector<24x128xf32>
    %c1_i32_53 = arith.constant 1 : i32
    %122 = tpu.dynamic_rotate %117 by %c1_i32_53 dim 0 : vector<24x128xf32>, i32 -> vector<24x128xf32>
    %c23_i32_54 = arith.constant 23 : i32
    %123 = tpu.dynamic_rotate %117 by %c23_i32_54 dim 0 : vector<24x128xf32>, i32 -> vector<24x128xf32>
    %cst_55 = arith.constant 0.414213568 : f32
    %124 = vector.broadcast %cst_55 : f32 to vector<24x128xf32>
    %125 = arith.mulf %114, %124 : vector<24x128xf32>
    %126 = arith.cmpf olt, %115, %125 : vector<24x128xf32>
    %cst_56 = arith.constant 2.41421366 : f32
    %127 = vector.broadcast %cst_56 : f32 to vector<24x128xf32>
    %128 = arith.mulf %114, %127 : vector<24x128xf32>
    %129 = arith.cmpf ogt, %115, %128 : vector<24x128xf32>
    %130 = arith.cmpf ogt, %113, %116 : vector<24x128xf32>
    %131 = arith.cmpf oge, %113, %117 : vector<24x128xf32>
    %132 = arith.andi %130, %131 : vector<24x128xi1>
    %133 = arith.cmpf ogt, %113, %118 : vector<24x128xf32>
    %134 = arith.cmpf oge, %113, %119 : vector<24x128xf32>
    %135 = arith.andi %133, %134 : vector<24x128xi1>
    %136 = arith.cmpf ogt, %113, %120 : vector<24x128xf32>
    %137 = arith.cmpf ogt, %113, %123 : vector<24x128xf32>
    %138 = arith.andi %136, %137 : vector<24x128xi1>
    %139 = arith.cmpf ogt, %113, %122 : vector<24x128xf32>
    %140 = arith.cmpf ogt, %113, %121 : vector<24x128xf32>
    %141 = arith.andi %139, %140 : vector<24x128xi1>
    %cst_57 = arith.constant 0.000000e+00 : f32
    %142 = vector.broadcast %cst_57 : f32 to vector<24x128xf32>
    %143 = arith.cmpf olt, %110, %142 : vector<24x128xf32>
    %cst_58 = arith.constant 0.000000e+00 : f32
    %144 = vector.broadcast %cst_58 : f32 to vector<24x128xf32>
    %145 = arith.cmpf olt, %111, %144 : vector<24x128xf32>
    %146 = arith.xori %143, %145 : vector<24x128xi1>
    %147 = arith.andi %146, %141 : vector<24x128xi1>
    %cst_59 = arith.constant dense<true> : vector<24x128xi1>
    %148 = arith.xori %146, %cst_59 : vector<24x128xi1>
    %149 = arith.andi %148, %138 : vector<24x128xi1>
    %150 = arith.ori %147, %149 : vector<24x128xi1>
    %151 = arith.andi %126, %132 : vector<24x128xi1>
    %cst_60 = arith.constant dense<true> : vector<24x128xi1>
    %152 = arith.xori %126, %cst_60 : vector<24x128xi1>
    %153 = arith.andi %152, %129 : vector<24x128xi1>
    %154 = arith.andi %153, %135 : vector<24x128xi1>
    %155 = arith.ori %151, %154 : vector<24x128xi1>
    %cst_61 = arith.constant dense<true> : vector<24x128xi1>
    %156 = arith.xori %126, %cst_61 : vector<24x128xi1>
    %cst_62 = arith.constant dense<true> : vector<24x128xi1>
    %157 = arith.xori %129, %cst_62 : vector<24x128xi1>
    %158 = arith.andi %156, %157 : vector<24x128xi1>
    %159 = arith.andi %158, %150 : vector<24x128xi1>
    %160 = arith.ori %155, %159 : vector<24x128xi1>
    %cst_63 = arith.constant 7.500000e+01 : f32
    %161 = vector.broadcast %cst_63 : f32 to vector<24x128xf32>
    %162 = arith.cmpf ogt, %113, %161 : vector<24x128xf32>
    %163 = arith.andi %162, %160 : vector<24x128xi1>
    %cst_64 = arith.constant 2.000000e+02 : f32
    %164 = vector.broadcast %cst_64 : f32 to vector<24x128xf32>
    %165 = arith.cmpf ogt, %113, %164 : vector<24x128xf32>
    %166 = arith.andi %163, %165 : vector<24x128xi1>
    %167 = arith.extui %166 : vector<24x128xi1> to vector<24x128xi32>
    %168 = arith.sitofp %167 : vector<24x128xi32> to vector<24x128xf32>
    %cst_65 = arith.constant dense<true> : vector<24x128xi1>
    %169 = arith.xori %166, %cst_65 : vector<24x128xi1>
    %170 = arith.andi %163, %169 : vector<24x128xi1>
    %171 = arith.extui %170 : vector<24x128xi1> to vector<24x128xi32>
    %172 = arith.sitofp %171 : vector<24x128xi32> to vector<24x128xf32>
    %173 = vector.shape_cast %172 : vector<24x128xf32> to vector<1x24x128xf32>
    %cst_66 = arith.constant dense<0xFF800000> : vector<1xf32>
    %174 = vector.multi_reduction <maximumf>, %173, %cst_66 [1, 2] : vector<1x24x128xf32> to vector<1xf32>
    %175 = vector.shape_cast %174 : vector<1xf32> to vector<1x1x1xf32>
    %176 = vector.extract %175[0, 0, 0] : f32 from vector<1x1x1xf32>
    %cst_67 = arith.constant 0.000000e+00 : f32
    %177 = arith.cmpf ogt, %176, %cst_67 : f32
    %178 = vector.shape_cast %168 : vector<24x128xf32> to vector<1x24x128xf32>
    %cst_68 = arith.constant dense<0xFF800000> : vector<1xf32>
    %179 = vector.multi_reduction <maximumf>, %178, %cst_68 [1, 2] : vector<1x24x128xf32> to vector<1xf32>
    %180 = vector.shape_cast %179 : vector<1xf32> to vector<1x1x1xf32>
    %181 = vector.extract %180[0, 0, 0] : f32 from vector<1x1x1xf32>
    %cst_69 = arith.constant 0.000000e+00 : f32
    %182 = arith.cmpf ogt, %181, %cst_69 : f32
    %183 = arith.andi %177, %182 : i1
    %c0_70 = arith.constant 0 : index
    %c0_71 = arith.constant 0 : index
    %c0_72 = arith.constant 0 : index
    %c0_73 = arith.constant 0 : index
    %184 = vector.load %arg2[%c0_70, %c0_71, %c0_72, %c0_73] : memref<1x3x24x128xf32, #tpu.memory_space<vmem>>, vector<1x1x24x128xf32>
    %185 = vector.shape_cast %184 : vector<1x1x24x128xf32> to vector<24x128xf32>
    %cst_74 = arith.constant 2.550000e+02 : f32
    %186 = vector.broadcast %cst_74 : f32 to vector<24x128xf32>
    %187 = arith.mulf %185, %186 : vector<24x128xf32>
    %cst_75 = arith.constant 0.000000e+00 : f32
    %cst_76 = arith.constant 2.550000e+02 : f32
    %188 = vector.broadcast %cst_75 : f32 to vector<24x128xf32>
    %189 = arith.maximumf %188, %187 : vector<24x128xf32>
    %190 = vector.broadcast %cst_76 : f32 to vector<24x128xf32>
    %191 = arith.minimumf %190, %189 : vector<24x128xf32>
    %192 = math.floor %191 : vector<24x128xf32>
    %c1_i32_77 = arith.constant 1 : i32
    %193 = tpu.dynamic_rotate %192 by %c1_i32_77 dim 0 : vector<24x128xf32>, i32 -> vector<24x128xf32>
    %cst_78 = arith.constant 2.000000e+00 : f32
    %194 = vector.broadcast %cst_78 : f32 to vector<24x128xf32>
    %195 = arith.mulf %194, %192 : vector<24x128xf32>
    %196 = arith.addf %193, %195 : vector<24x128xf32>
    %c23_i32_79 = arith.constant 23 : i32
    %197 = tpu.dynamic_rotate %192 by %c23_i32_79 dim 0 : vector<24x128xf32>, i32 -> vector<24x128xf32>
    %198 = arith.addf %196, %197 : vector<24x128xf32>
    %c1_i32_80 = arith.constant 1 : i32
    %199 = tpu.dynamic_rotate %192 by %c1_i32_80 dim 1 : vector<24x128xf32>, i32 -> vector<24x128xf32>
    %cst_81 = arith.constant 2.000000e+00 : f32
    %200 = vector.broadcast %cst_81 : f32 to vector<24x128xf32>
    %201 = arith.mulf %200, %192 : vector<24x128xf32>
    %202 = arith.addf %199, %201 : vector<24x128xf32>
    %c127_i32_82 = arith.constant 127 : i32
    %203 = tpu.dynamic_rotate %192 by %c127_i32_82 dim 1 : vector<24x128xf32>, i32 -> vector<24x128xf32>
    %204 = arith.addf %202, %203 : vector<24x128xf32>
    %c127_i32_83 = arith.constant 127 : i32
    %205 = tpu.dynamic_rotate %198 by %c127_i32_83 dim 1 : vector<24x128xf32>, i32 -> vector<24x128xf32>
    %c1_i32_84 = arith.constant 1 : i32
    %206 = tpu.dynamic_rotate %198 by %c1_i32_84 dim 1 : vector<24x128xf32>, i32 -> vector<24x128xf32>
    %207 = arith.subf %205, %206 : vector<24x128xf32>
    %c23_i32_85 = arith.constant 23 : i32
    %208 = tpu.dynamic_rotate %204 by %c23_i32_85 dim 0 : vector<24x128xf32>, i32 -> vector<24x128xf32>
    %c1_i32_86 = arith.constant 1 : i32
    %209 = tpu.dynamic_rotate %204 by %c1_i32_86 dim 0 : vector<24x128xf32>, i32 -> vector<24x128xf32>
    %210 = arith.subf %208, %209 : vector<24x128xf32>
    %211 = math.absf %207 : vector<24x128xf32>
    %212 = math.absf %210 : vector<24x128xf32>
    %213 = arith.addf %211, %212 : vector<24x128xf32>
    %c0_87 = arith.constant 0 : index
    %c1_88 = arith.constant 1 : index
    %c0_89 = arith.constant 0 : index
    %c0_90 = arith.constant 0 : index
    %214 = vector.load %arg2[%c0_87, %c1_88, %c0_89, %c0_90] : memref<1x3x24x128xf32, #tpu.memory_space<vmem>>, vector<1x1x24x128xf32>
    %215 = vector.shape_cast %214 : vector<1x1x24x128xf32> to vector<24x128xf32>
    %cst_91 = arith.constant 2.550000e+02 : f32
    %216 = vector.broadcast %cst_91 : f32 to vector<24x128xf32>
    %217 = arith.mulf %215, %216 : vector<24x128xf32>
    %cst_92 = arith.constant 0.000000e+00 : f32
    %cst_93 = arith.constant 2.550000e+02 : f32
    %218 = vector.broadcast %cst_92 : f32 to vector<24x128xf32>
    %219 = arith.maximumf %218, %217 : vector<24x128xf32>
    %220 = vector.broadcast %cst_93 : f32 to vector<24x128xf32>
    %221 = arith.minimumf %220, %219 : vector<24x128xf32>
    %222 = math.floor %221 : vector<24x128xf32>
    %c1_i32_94 = arith.constant 1 : i32
    %223 = tpu.dynamic_rotate %222 by %c1_i32_94 dim 0 : vector<24x128xf32>, i32 -> vector<24x128xf32>
    %cst_95 = arith.constant 2.000000e+00 : f32
    %224 = vector.broadcast %cst_95 : f32 to vector<24x128xf32>
    %225 = arith.mulf %224, %222 : vector<24x128xf32>
    %226 = arith.addf %223, %225 : vector<24x128xf32>
    %c23_i32_96 = arith.constant 23 : i32
    %227 = tpu.dynamic_rotate %222 by %c23_i32_96 dim 0 : vector<24x128xf32>, i32 -> vector<24x128xf32>
    %228 = arith.addf %226, %227 : vector<24x128xf32>
    %c1_i32_97 = arith.constant 1 : i32
    %229 = tpu.dynamic_rotate %222 by %c1_i32_97 dim 1 : vector<24x128xf32>, i32 -> vector<24x128xf32>
    %cst_98 = arith.constant 2.000000e+00 : f32
    %230 = vector.broadcast %cst_98 : f32 to vector<24x128xf32>
    %231 = arith.mulf %230, %222 : vector<24x128xf32>
    %232 = arith.addf %229, %231 : vector<24x128xf32>
    %c127_i32_99 = arith.constant 127 : i32
    %233 = tpu.dynamic_rotate %222 by %c127_i32_99 dim 1 : vector<24x128xf32>, i32 -> vector<24x128xf32>
    %234 = arith.addf %232, %233 : vector<24x128xf32>
    %c127_i32_100 = arith.constant 127 : i32
    %235 = tpu.dynamic_rotate %228 by %c127_i32_100 dim 1 : vector<24x128xf32>, i32 -> vector<24x128xf32>
    %c1_i32_101 = arith.constant 1 : i32
    %236 = tpu.dynamic_rotate %228 by %c1_i32_101 dim 1 : vector<24x128xf32>, i32 -> vector<24x128xf32>
    %237 = arith.subf %235, %236 : vector<24x128xf32>
    %c23_i32_102 = arith.constant 23 : i32
    %238 = tpu.dynamic_rotate %234 by %c23_i32_102 dim 0 : vector<24x128xf32>, i32 -> vector<24x128xf32>
    %c1_i32_103 = arith.constant 1 : i32
    %239 = tpu.dynamic_rotate %234 by %c1_i32_103 dim 0 : vector<24x128xf32>, i32 -> vector<24x128xf32>
    %240 = arith.subf %238, %239 : vector<24x128xf32>
    %241 = math.absf %237 : vector<24x128xf32>
    %242 = math.absf %240 : vector<24x128xf32>
    %243 = arith.addf %241, %242 : vector<24x128xf32>
    %244 = arith.cmpf ogt, %243, %213 : vector<24x128xf32>
    %245 = arith.select %244, %237, %207 : vector<24x128xi1>, vector<24x128xf32>
    %246 = arith.select %244, %240, %210 : vector<24x128xi1>, vector<24x128xf32>
    %247 = arith.select %244, %243, %213 : vector<24x128xi1>, vector<24x128xf32>
    %c0_104 = arith.constant 0 : index
    %c2_105 = arith.constant 2 : index
    %c0_106 = arith.constant 0 : index
    %c0_107 = arith.constant 0 : index
    %248 = vector.load %arg2[%c0_104, %c2_105, %c0_106, %c0_107] : memref<1x3x24x128xf32, #tpu.memory_space<vmem>>, vector<1x1x24x128xf32>
    %249 = vector.shape_cast %248 : vector<1x1x24x128xf32> to vector<24x128xf32>
    %cst_108 = arith.constant 2.550000e+02 : f32
    %250 = vector.broadcast %cst_108 : f32 to vector<24x128xf32>
    %251 = arith.mulf %249, %250 : vector<24x128xf32>
    %cst_109 = arith.constant 0.000000e+00 : f32
    %cst_110 = arith.constant 2.550000e+02 : f32
    %252 = vector.broadcast %cst_109 : f32 to vector<24x128xf32>
    %253 = arith.maximumf %252, %251 : vector<24x128xf32>
    %254 = vector.broadcast %cst_110 : f32 to vector<24x128xf32>
    %255 = arith.minimumf %254, %253 : vector<24x128xf32>
    %256 = math.floor %255 : vector<24x128xf32>
    %c1_i32_111 = arith.constant 1 : i32
    %257 = tpu.dynamic_rotate %256 by %c1_i32_111 dim 0 : vector<24x128xf32>, i32 -> vector<24x128xf32>
    %cst_112 = arith.constant 2.000000e+00 : f32
    %258 = vector.broadcast %cst_112 : f32 to vector<24x128xf32>
    %259 = arith.mulf %258, %256 : vector<24x128xf32>
    %260 = arith.addf %257, %259 : vector<24x128xf32>
    %c23_i32_113 = arith.constant 23 : i32
    %261 = tpu.dynamic_rotate %256 by %c23_i32_113 dim 0 : vector<24x128xf32>, i32 -> vector<24x128xf32>
    %262 = arith.addf %260, %261 : vector<24x128xf32>
    %c1_i32_114 = arith.constant 1 : i32
    %263 = tpu.dynamic_rotate %256 by %c1_i32_114 dim 1 : vector<24x128xf32>, i32 -> vector<24x128xf32>
    %cst_115 = arith.constant 2.000000e+00 : f32
    %264 = vector.broadcast %cst_115 : f32 to vector<24x128xf32>
    %265 = arith.mulf %264, %256 : vector<24x128xf32>
    %266 = arith.addf %263, %265 : vector<24x128xf32>
    %c127_i32_116 = arith.constant 127 : i32
    %267 = tpu.dynamic_rotate %256 by %c127_i32_116 dim 1 : vector<24x128xf32>, i32 -> vector<24x128xf32>
    %268 = arith.addf %266, %267 : vector<24x128xf32>
    %c127_i32_117 = arith.constant 127 : i32
    %269 = tpu.dynamic_rotate %262 by %c127_i32_117 dim 1 : vector<24x128xf32>, i32 -> vector<24x128xf32>
    %c1_i32_118 = arith.constant 1 : i32
    %270 = tpu.dynamic_rotate %262 by %c1_i32_118 dim 1 : vector<24x128xf32>, i32 -> vector<24x128xf32>
    %271 = arith.subf %269, %270 : vector<24x128xf32>
    %c23_i32_119 = arith.constant 23 : i32
    %272 = tpu.dynamic_rotate %268 by %c23_i32_119 dim 0 : vector<24x128xf32>, i32 -> vector<24x128xf32>
    %c1_i32_120 = arith.constant 1 : i32
    %273 = tpu.dynamic_rotate %268 by %c1_i32_120 dim 0 : vector<24x128xf32>, i32 -> vector<24x128xf32>
    %274 = arith.subf %272, %273 : vector<24x128xf32>
    %275 = math.absf %271 : vector<24x128xf32>
    %276 = math.absf %274 : vector<24x128xf32>
    %277 = arith.addf %275, %276 : vector<24x128xf32>
    %278 = arith.cmpf ogt, %277, %247 : vector<24x128xf32>
    %279 = arith.select %278, %271, %245 : vector<24x128xi1>, vector<24x128xf32>
    %280 = arith.select %278, %274, %246 : vector<24x128xi1>, vector<24x128xf32>
    %281 = arith.select %278, %277, %247 : vector<24x128xi1>, vector<24x128xf32>
    %282 = arith.mulf %281, %14 : vector<24x128xf32>
    %283 = math.absf %279 : vector<24x128xf32>
    %284 = math.absf %280 : vector<24x128xf32>
    %c1_i32_121 = arith.constant 1 : i32
    %285 = tpu.dynamic_rotate %282 by %c1_i32_121 dim 1 : vector<24x128xf32>, i32 -> vector<24x128xf32>
    %c127_i32_122 = arith.constant 127 : i32
    %286 = tpu.dynamic_rotate %282 by %c127_i32_122 dim 1 : vector<24x128xf32>, i32 -> vector<24x128xf32>
    %c1_i32_123 = arith.constant 1 : i32
    %287 = tpu.dynamic_rotate %282 by %c1_i32_123 dim 0 : vector<24x128xf32>, i32 -> vector<24x128xf32>
    %c23_i32_124 = arith.constant 23 : i32
    %288 = tpu.dynamic_rotate %282 by %c23_i32_124 dim 0 : vector<24x128xf32>, i32 -> vector<24x128xf32>
    %c1_i32_125 = arith.constant 1 : i32
    %289 = tpu.dynamic_rotate %285 by %c1_i32_125 dim 0 : vector<24x128xf32>, i32 -> vector<24x128xf32>
    %c23_i32_126 = arith.constant 23 : i32
    %290 = tpu.dynamic_rotate %285 by %c23_i32_126 dim 0 : vector<24x128xf32>, i32 -> vector<24x128xf32>
    %c1_i32_127 = arith.constant 1 : i32
    %291 = tpu.dynamic_rotate %286 by %c1_i32_127 dim 0 : vector<24x128xf32>, i32 -> vector<24x128xf32>
    %c23_i32_128 = arith.constant 23 : i32
    %292 = tpu.dynamic_rotate %286 by %c23_i32_128 dim 0 : vector<24x128xf32>, i32 -> vector<24x128xf32>
    %cst_129 = arith.constant 0.414213568 : f32
    %293 = vector.broadcast %cst_129 : f32 to vector<24x128xf32>
    %294 = arith.mulf %283, %293 : vector<24x128xf32>
    %295 = arith.cmpf olt, %284, %294 : vector<24x128xf32>
    %cst_130 = arith.constant 2.41421366 : f32
    %296 = vector.broadcast %cst_130 : f32 to vector<24x128xf32>
    %297 = arith.mulf %283, %296 : vector<24x128xf32>
    %298 = arith.cmpf ogt, %284, %297 : vector<24x128xf32>
    %299 = arith.cmpf ogt, %282, %285 : vector<24x128xf32>
    %300 = arith.cmpf oge, %282, %286 : vector<24x128xf32>
    %301 = arith.andi %299, %300 : vector<24x128xi1>
    %302 = arith.cmpf ogt, %282, %287 : vector<24x128xf32>
    %303 = arith.cmpf oge, %282, %288 : vector<24x128xf32>
    %304 = arith.andi %302, %303 : vector<24x128xi1>
    %305 = arith.cmpf ogt, %282, %289 : vector<24x128xf32>
    %306 = arith.cmpf ogt, %282, %292 : vector<24x128xf32>
    %307 = arith.andi %305, %306 : vector<24x128xi1>
    %308 = arith.cmpf ogt, %282, %291 : vector<24x128xf32>
    %309 = arith.cmpf ogt, %282, %290 : vector<24x128xf32>
    %310 = arith.andi %308, %309 : vector<24x128xi1>
    %cst_131 = arith.constant 0.000000e+00 : f32
    %311 = vector.broadcast %cst_131 : f32 to vector<24x128xf32>
    %312 = arith.cmpf olt, %279, %311 : vector<24x128xf32>
    %cst_132 = arith.constant 0.000000e+00 : f32
    %313 = vector.broadcast %cst_132 : f32 to vector<24x128xf32>
    %314 = arith.cmpf olt, %280, %313 : vector<24x128xf32>
    %315 = arith.xori %312, %314 : vector<24x128xi1>
    %316 = arith.andi %315, %310 : vector<24x128xi1>
    %cst_133 = arith.constant dense<true> : vector<24x128xi1>
    %317 = arith.xori %315, %cst_133 : vector<24x128xi1>
    %318 = arith.andi %317, %307 : vector<24x128xi1>
    %319 = arith.ori %316, %318 : vector<24x128xi1>
    %320 = arith.andi %295, %301 : vector<24x128xi1>
    %cst_134 = arith.constant dense<true> : vector<24x128xi1>
    %321 = arith.xori %295, %cst_134 : vector<24x128xi1>
    %322 = arith.andi %321, %298 : vector<24x128xi1>
    %323 = arith.andi %322, %304 : vector<24x128xi1>
    %324 = arith.ori %320, %323 : vector<24x128xi1>
    %cst_135 = arith.constant dense<true> : vector<24x128xi1>
    %325 = arith.xori %295, %cst_135 : vector<24x128xi1>
    %cst_136 = arith.constant dense<true> : vector<24x128xi1>
    %326 = arith.xori %298, %cst_136 : vector<24x128xi1>
    %327 = arith.andi %325, %326 : vector<24x128xi1>
    %328 = arith.andi %327, %319 : vector<24x128xi1>
    %329 = arith.ori %324, %328 : vector<24x128xi1>
    %cst_137 = arith.constant 7.500000e+01 : f32
    %330 = vector.broadcast %cst_137 : f32 to vector<24x128xf32>
    %331 = arith.cmpf ogt, %282, %330 : vector<24x128xf32>
    %332 = arith.andi %331, %329 : vector<24x128xi1>
    %cst_138 = arith.constant 2.000000e+02 : f32
    %333 = vector.broadcast %cst_138 : f32 to vector<24x128xf32>
    %334 = arith.cmpf ogt, %282, %333 : vector<24x128xf32>
    %335 = arith.andi %332, %334 : vector<24x128xi1>
    %336 = arith.extui %335 : vector<24x128xi1> to vector<24x128xi32>
    %337 = arith.sitofp %336 : vector<24x128xi32> to vector<24x128xf32>
    %cst_139 = arith.constant dense<true> : vector<24x128xi1>
    %338 = arith.xori %335, %cst_139 : vector<24x128xi1>
    %339 = arith.andi %332, %338 : vector<24x128xi1>
    %340 = arith.extui %339 : vector<24x128xi1> to vector<24x128xi32>
    %341 = arith.sitofp %340 : vector<24x128xi32> to vector<24x128xf32>
    %342 = vector.shape_cast %341 : vector<24x128xf32> to vector<1x24x128xf32>
    %cst_140 = arith.constant dense<0xFF800000> : vector<1xf32>
    %343 = vector.multi_reduction <maximumf>, %342, %cst_140 [1, 2] : vector<1x24x128xf32> to vector<1xf32>
    %344 = vector.shape_cast %343 : vector<1xf32> to vector<1x1x1xf32>
    %345 = vector.extract %344[0, 0, 0] : f32 from vector<1x1x1xf32>
    %cst_141 = arith.constant 0.000000e+00 : f32
    %346 = arith.cmpf ogt, %345, %cst_141 : f32
    %347 = vector.shape_cast %337 : vector<24x128xf32> to vector<1x24x128xf32>
    %cst_142 = arith.constant dense<0xFF800000> : vector<1xf32>
    %348 = vector.multi_reduction <maximumf>, %347, %cst_142 [1, 2] : vector<1x24x128xf32> to vector<1xf32>
    %349 = vector.shape_cast %348 : vector<1xf32> to vector<1x1x1xf32>
    %350 = vector.extract %349[0, 0, 0] : f32 from vector<1x1x1xf32>
    %cst_143 = arith.constant 0.000000e+00 : f32
    %351 = arith.cmpf ogt, %350, %cst_143 : f32
    %352 = arith.andi %346, %351 : i1
    %353 = arith.ori %183, %352 : i1
    %c0_i32 = arith.constant 0 : i32
    %354:4 = scf.while (%arg4 = %c0_i32, %arg5 = %168, %arg6 = %337, %arg7 = %353) : (i32, vector<24x128xf32>, vector<24x128xf32>, i1) -> (i32, vector<24x128xf32>, vector<24x128xf32>, i1) {
      %c256_i32 = arith.constant 256 : i32
      %363 = arith.cmpi slt, %arg4, %c256_i32 : i32
      %364 = arith.andi %363, %arg7 : i1
      scf.condition(%364) %arg4, %arg5, %arg6, %arg7 : i32, vector<24x128xf32>, vector<24x128xf32>, i1
    } do {
    ^bb0(%arg4: i32, %arg5: vector<24x128xf32>, %arg6: vector<24x128xf32>, %arg7: i1):
      %c1_i32_148 = arith.constant 1 : i32
      %363 = tpu.dynamic_rotate %arg5 by %c1_i32_148 dim 0 : vector<24x128xf32>, i32 -> vector<24x128xf32>
      %c23_i32_149 = arith.constant 23 : i32
      %364 = tpu.dynamic_rotate %arg5 by %c23_i32_149 dim 0 : vector<24x128xf32>, i32 -> vector<24x128xf32>
      %365 = arith.maximumf %363, %364 : vector<24x128xf32>
      %366 = arith.maximumf %arg5, %365 : vector<24x128xf32>
      %c1_i32_150 = arith.constant 1 : i32
      %367 = tpu.dynamic_rotate %366 by %c1_i32_150 dim 1 : vector<24x128xf32>, i32 -> vector<24x128xf32>
      %c127_i32_151 = arith.constant 127 : i32
      %368 = tpu.dynamic_rotate %366 by %c127_i32_151 dim 1 : vector<24x128xf32>, i32 -> vector<24x128xf32>
      %369 = arith.maximumf %367, %368 : vector<24x128xf32>
      %370 = arith.maximumf %366, %369 : vector<24x128xf32>
      %371 = arith.mulf %370, %172 : vector<24x128xf32>
      %372 = arith.maximumf %arg5, %371 : vector<24x128xf32>
      %c1_i32_152 = arith.constant 1 : i32
      %373 = tpu.dynamic_rotate %372 by %c1_i32_152 dim 0 : vector<24x128xf32>, i32 -> vector<24x128xf32>
      %c23_i32_153 = arith.constant 23 : i32
      %374 = tpu.dynamic_rotate %372 by %c23_i32_153 dim 0 : vector<24x128xf32>, i32 -> vector<24x128xf32>
      %375 = arith.maximumf %373, %374 : vector<24x128xf32>
      %376 = arith.maximumf %372, %375 : vector<24x128xf32>
      %c1_i32_154 = arith.constant 1 : i32
      %377 = tpu.dynamic_rotate %376 by %c1_i32_154 dim 1 : vector<24x128xf32>, i32 -> vector<24x128xf32>
      %c127_i32_155 = arith.constant 127 : i32
      %378 = tpu.dynamic_rotate %376 by %c127_i32_155 dim 1 : vector<24x128xf32>, i32 -> vector<24x128xf32>
      %379 = arith.maximumf %377, %378 : vector<24x128xf32>
      %380 = arith.maximumf %376, %379 : vector<24x128xf32>
      %381 = arith.mulf %380, %172 : vector<24x128xf32>
      %382 = arith.maximumf %372, %381 : vector<24x128xf32>
      %c1_i32_156 = arith.constant 1 : i32
      %383 = tpu.dynamic_rotate %arg6 by %c1_i32_156 dim 0 : vector<24x128xf32>, i32 -> vector<24x128xf32>
      %c23_i32_157 = arith.constant 23 : i32
      %384 = tpu.dynamic_rotate %arg6 by %c23_i32_157 dim 0 : vector<24x128xf32>, i32 -> vector<24x128xf32>
      %385 = arith.maximumf %383, %384 : vector<24x128xf32>
      %386 = arith.maximumf %arg6, %385 : vector<24x128xf32>
      %c1_i32_158 = arith.constant 1 : i32
      %387 = tpu.dynamic_rotate %386 by %c1_i32_158 dim 1 : vector<24x128xf32>, i32 -> vector<24x128xf32>
      %c127_i32_159 = arith.constant 127 : i32
      %388 = tpu.dynamic_rotate %386 by %c127_i32_159 dim 1 : vector<24x128xf32>, i32 -> vector<24x128xf32>
      %389 = arith.maximumf %387, %388 : vector<24x128xf32>
      %390 = arith.maximumf %386, %389 : vector<24x128xf32>
      %391 = arith.mulf %390, %341 : vector<24x128xf32>
      %392 = arith.maximumf %arg6, %391 : vector<24x128xf32>
      %c1_i32_160 = arith.constant 1 : i32
      %393 = tpu.dynamic_rotate %392 by %c1_i32_160 dim 0 : vector<24x128xf32>, i32 -> vector<24x128xf32>
      %c23_i32_161 = arith.constant 23 : i32
      %394 = tpu.dynamic_rotate %392 by %c23_i32_161 dim 0 : vector<24x128xf32>, i32 -> vector<24x128xf32>
      %395 = arith.maximumf %393, %394 : vector<24x128xf32>
      %396 = arith.maximumf %392, %395 : vector<24x128xf32>
      %c1_i32_162 = arith.constant 1 : i32
      %397 = tpu.dynamic_rotate %396 by %c1_i32_162 dim 1 : vector<24x128xf32>, i32 -> vector<24x128xf32>
      %c127_i32_163 = arith.constant 127 : i32
      %398 = tpu.dynamic_rotate %396 by %c127_i32_163 dim 1 : vector<24x128xf32>, i32 -> vector<24x128xf32>
      %399 = arith.maximumf %397, %398 : vector<24x128xf32>
      %400 = arith.maximumf %396, %399 : vector<24x128xf32>
      %401 = arith.mulf %400, %341 : vector<24x128xf32>
      %402 = arith.maximumf %392, %401 : vector<24x128xf32>
      %403 = arith.subf %382, %arg5 : vector<24x128xf32>
      %404 = vector.shape_cast %403 : vector<24x128xf32> to vector<1x24x128xf32>
      %cst_164 = arith.constant dense<0xFF800000> : vector<1xf32>
      %405 = vector.multi_reduction <maximumf>, %404, %cst_164 [1, 2] : vector<1x24x128xf32> to vector<1xf32>
      %406 = vector.shape_cast %405 : vector<1xf32> to vector<1x1x1xf32>
      %407 = vector.extract %406[0, 0, 0] : f32 from vector<1x1x1xf32>
      %408 = arith.subf %402, %arg6 : vector<24x128xf32>
      %409 = vector.shape_cast %408 : vector<24x128xf32> to vector<1x24x128xf32>
      %cst_165 = arith.constant dense<0xFF800000> : vector<1xf32>
      %410 = vector.multi_reduction <maximumf>, %409, %cst_165 [1, 2] : vector<1x24x128xf32> to vector<1xf32>
      %411 = vector.shape_cast %410 : vector<1xf32> to vector<1x1x1xf32>
      %412 = vector.extract %411[0, 0, 0] : f32 from vector<1x1x1xf32>
      %413 = arith.maximumf %407, %412 : f32
      %cst_166 = arith.constant 0.000000e+00 : f32
      %414 = arith.cmpf ogt, %413, %cst_166 : f32
      %c1_i32_167 = arith.constant 1 : i32
      %415 = arith.addi %arg4, %c1_i32_167 : i32
      scf.yield %415, %382, %402, %414 : i32, vector<24x128xf32>, vector<24x128xf32>, i1
    }
    %355 = arith.subf %354#1, %354#2 : vector<24x128xf32>
    %356 = math.absf %355 : vector<24x128xf32>
    %357 = vector.shape_cast %356 : vector<24x128xf32> to vector<1x24x128xf32>
    %cst_144 = arith.constant dense<0.000000e+00> : vector<1xf32>
    %358 = vector.multi_reduction <add>, %357, %cst_144 [1, 2] : vector<1x24x128xf32> to vector<1xf32>
    %359 = vector.shape_cast %358 : vector<1xf32> to vector<1x1x1xf32>
    %360 = vector.extract %359[0, 0, 0] : f32 from vector<1x1x1xf32>
    %361 = vector.broadcast %360 : f32 to vector<1x8x128xf32>
    %c0_145 = arith.constant 0 : index
    %c0_146 = arith.constant 0 : index
    %c0_147 = arith.constant 0 : index
    %362 = vector.load %arg3[%c0_145, %c0_146, %c0_147] : memref<1x8x128xf32, #tpu.memory_space<vmem>>, vector<1x8x128xf32>
    tpu.vector_store %arg3[%c0_145, %c0_146, %c0_147], %361 {strides = array<i32>} : memref<1x8x128xf32, #tpu.memory_space<vmem>>, vector<1x8x128xf32>,
    return
  }
  func.func @transform_0(%arg0: i32) -> (i32, i32, i32, i32) {
    %c0_i32 = arith.constant 0 : i32
    %c0_i32_0 = arith.constant 0 : i32
    %c0_i32_1 = arith.constant 0 : i32
    %c0_i32_2 = arith.constant 0 : i32
    return %arg0, %c0_i32, %c0_i32_0, %c0_i32_1 : i32, i32, i32, i32
  }
  func.func @transform_1(%arg0: i32) -> (i32, i32, i32, i32) {
    %c0_i32 = arith.constant 0 : i32
    %c0_i32_0 = arith.constant 0 : i32
    %c0_i32_1 = arith.constant 0 : i32
    %c0_i32_2 = arith.constant 0 : i32
    return %arg0, %c0_i32, %c0_i32_0, %c0_i32_1 : i32, i32, i32, i32
  }
  func.func @transform_2(%arg0: i32) -> (i32, i32, i32) {
    %c0_i32 = arith.constant 0 : i32
    %c0_i32_0 = arith.constant 0 : i32
    %c0_i32_1 = arith.constant 0 : i32
    return %arg0, %c0_i32, %c0_i32_0 : i32, i32, i32
  }
}

</mosaic_0001>

<bundles_post_ra>
// kernel: canny_edge_loss_mean.1
= control target key start
LH: loop header
LB: loop body
LE: loop exit
PB: predicated region body
PF: predicated region fallthrough
CT: control target
= control target key end

     0   :  { %s1848_s9 = smov 0   ;;  %s3788_s0 = inlined_call_operand.vmem [shape: f32[2,3,24,128], index: 0, kind: input, shape index: {}]   ;;  %s3789_s1 = inlined_call_operand.vmem [shape: f32[2,3,24,128], index: 1, kind: input, shape index: {}]   ;;  %s3790_s2 = inlined_call_operand.vmem [shape: f32[2,8,128], index: 2, kind: output, shape index: {}]  }
   0x1 LB: > { %s1544_s10 = sadd.s32 4294967295, %s1773_s9   ;;  %p1548_p0 = scmp.ge.s32.totalorder %s1773_s9, 1  ;;  %s1773_s9 = sphi %s1848_s9, %s12_s9  }
   0x2   : > { %p122_p1 = scmp.lt.s32.totalorder %s1773_s9, 3 }
   0x4   : > { %p123_p2 = pnand %p1548_p0, %p122_p1 }
   0x5   : > { %p148_p3 = scmp.lt.s32.totalorder (!%p123_p2), %s1544_s10, 1  ;;  %v162_v0 = vlaneseq (!%p123_p2)  ;;  %s1827_s22 = smov (!%p123_p2), 1  }
   0x6   : > { %126 = sbr.rel (%p123_p2) target bundleno = 1480 (0x5c8), region = 28  ;;  %s1828_s23 = smov (!%p123_p2), 127  }
   0x7   : > { %v1880_v15 = vshrl.u32 (!%p123_p2), %v162_v0, 7 }
   0x9   : > { %vm3792_vm0 = vcmp.lt.s32.totalorder (!%p123_p2), %v1880_v15, 1  ;;  %vm3791_vm1 = vcmp.lt.s32.totalorder (!%p123_p2), %v1880_v15, 7  ;;  %vm168_vm6 = vcmp.ge.s32.totalorder (!%p123_p2), %v1880_v15, 1 }
   0xd   : > { %s4147_s10 = smov (!%p148_p3, %s1544_s10), 1 }
   0xe   : > { %s1582_s11 = smul.u32 72, %s4147_s10  ;;  %s1551_s12 = sshll.u32 %s4147_s10, 3 }
   0xf   : > { %s1859_s15 = scalar_lea.vmem %s3790_s2, %s1551_s12 }
  0x10   : > { %s1864_s18 = scalar_lea.vmem %s3788_s0, %s1582_s11  ;;  %s1869_s21 = scalar_lea.vmem %s3789_s1, %s1582_s11 }
  0x11   : > { %v193_v1 = vld [vmem:[%s1864_s18 + $0x10] sm:$0xff]  ;;  %v191_v2 = vld [vmem:[%s1864_s18] sm:$0xff]  ;;  %v1555_v3 = vld [vmem:[%s1864_s18 + $0x18] sm:$0xff] }
  0x12   : > { %v196_v4 = vmul.f32 255.0, %v193_v1  ;;  %v194_v5 = vmul.f32 255.0, %v191_v2  ;;  %v290_v6 = vmul.f32 255.0, %v1555_v3  ;;  %v192_v7 = vld [vmem:[%s1864_s18 + $0x8] sm:$0xff]  ;;  %v1556_v9 = vld [vmem:[%s1864_s18 + $0x20] sm:$0xff]  ;;  %v1567_v28 = vld [vmem:[%s1869_s21 + $0x18] sm:$0xff] }
  0x13   : > { %v1557_v8 = vld [vmem:[%s1864_s18 + $0x28] sm:$0xff]  ;;  %v195_v10 = vmul.f32 255.0, %v192_v7  ;;  %v291_v12 = vmul.f32 255.0, %v1556_v9  ;;  %v707_v14 = vld [vmem:[%s1869_s21] sm:$0xff]  ;;  %v709_v33 = vld [vmem:[%s1869_s21 + $0x10] sm:$0xff]  ;;  %v804_v48 = vmul.f32 255.0, %v1567_v28 }
  0x14   : > { %v292_v11 = vmul.f32 255.0, %v1557_v8  ;;  %v708_v13 = vld [vmem:[%s1869_s21 + $0x8] sm:$0xff]  ;;  %v199_v16 = vmax.f32 %v196_v4, 0.0  ;;  %v197_v17 = vmax.f32 %v194_v5, 0.0  ;;  %v293_v18 = vmax.f32 %v290_v6, 0.0  ;;  %v1568_v39 = vld [vmem:[%s1869_s21 + $0x20] sm:$0xff] }
  0x15   : > { %v711_v19 = vmul.f32 255.0, %v708_v13  ;;  %v198_v20 = vmax.f32 %v195_v10, 0.0  ;;  %v294_v22 = vmax.f32 %v291_v12, 0.0  ;;  %v710_v23 = vmul.f32 255.0, %v707_v14  ;;  %v1569_v34 = vld [vmem:[%s1869_s21 + $0x28] sm:$0xff]  ;;  %v1559_v40 = vld [vmem:[%s1864_s18 + $0x38] sm:$0xff] }
  0x16   : > { %v295_v21 = vmax.f32 %v292_v11, 0.0  ;;  %v202_v24 = vmin.f32 %v199_v16, 255.0  ;;  %v200_v25 = vmin.f32 %v197_v17, 255.0  ;;  %v296_v26 = vmin.f32 %v293_v18, 255.0  ;;  %v1558_v41 = vld [vmem:[%s1864_s18 + $0x30] sm:$0xff]  ;;  %v1560_v46 = vld [vmem:[%s1864_s18 + $0x40] sm:$0xff] }
  0x17   : > { %v714_v27 = vmax.f32 %v711_v19, 0.0  ;;  %v201_v29 = vmin.f32 %v198_v20, 255.0  ;;  %v297_v31 = vmin.f32 %v294_v22, 255.0  ;;  %v713_v32 = vmax.f32 %v710_v23, 0.0  ;;  %v1570_v51 = vld [vmem:[%s1869_s21 + $0x30] sm:$0xff]  ;;  %v1572_v9 = vld [vmem:[%s1869_s21 + $0x40] sm:$0xff] }
  0x18   : > { %v298_v30 = vmin.f32 %v295_v21, 255.0  ;;  %v1885_v35 = vfloor.f32 %v202_v24  ;;  %v1887_v36 = vfloor.f32 %v200_v25  ;;  %v1889_v37 = vfloor.f32 %v296_v26  ;;  %v1571_v10 = vld [vmem:[%s1869_s21 + $0x38] sm:$0xff] }
  0x19   : > { %v717_v38 = vmin.f32 %v714_v27, 255.0  ;;  %v1894_v42 = vfloor.f32 %v201_v29  ;;  %v1898_v44 = vfloor.f32 %v297_v31  ;;  %v716_v45 = vmin.f32 %v713_v32, 255.0 }
  0x1a   : > { %v1896_v43 = vfloor.f32 %v298_v30  ;;  %233 = vrot.lane.b32.xlu1 %v1885_v35, %s1827_s22  ;;  %229 = vrot.lane.b32.xlu0 %v1887_v36, %s1827_s22  ;;  %v712_v49 = vmul.f32 255.0, %v709_v33  ;;  %v806_v50 = vmul.f32 255.0, %v1569_v34  ;;  %v805_v53 = vmul.f32 255.0, %v1568_v39 }
  0x1b   : > { %v1905_v47 = vfloor.f32 %v717_v38  ;;  %v1909_v52 = vfloor.f32 %v716_v45  ;;  %v397_v54 = vmul.f32 255.0, %v1559_v40  ;;  %v396_v55 = vmul.f32 255.0, %v1558_v41 }
  0x1c   : > { %v807_v56 = vmax.f32 %v804_v48, 0.0  ;;  %v715_v57 = vmax.f32 %v712_v49, 0.0  ;;  %v809_v58 = vmax.f32 %v806_v50, 0.0  ;;  %v398_v59 = vmul.f32 255.0, %v1560_v46 }
  0x1d   : > { %v808_v60 = vmax.f32 %v805_v53, 0.0  ;;  %v400_v61 = vmax.f32 %v397_v54, 0.0  ;;  %v399_v62 = vmax.f32 %v396_v55, 0.0  ;;  %v910_v63 = vmul.f32 255.0, %v1570_v51 }
  0x1e   : > { %323 = vrot.lane.b32.xlu1 %v1889_v37, %s1827_s22  ;;  %231 = vrot.lane.b32.xlu0 %v1894_v42, %s1827_s22  ;;  %v810_v1 = vmin.f32 %v807_v56, 255.0  ;;  %v718_v2 = vmin.f32 %v715_v57, 255.0  ;;  %v812_v3 = vmin.f32 %v809_v58, 255.0  ;;  %v401_v4 = vmax.f32 %v398_v59, 0.0 }
  0x1f   : > { %v811_v5 = vmin.f32 %v808_v60, 255.0  ;;  %v403_v6 = vmin.f32 %v400_v61, 255.0  ;;  %v402_v7 = vmin.f32 %v399_v62, 255.0  ;;  %v913_v8 = vmax.f32 %v910_v63, 0.0 }
  0x20   : > { %v1918_v11 = vfloor.f32 %v810_v1  ;;  %v1920_v12 = vfloor.f32 %v718_v2  ;;  %v1922_v13 = vfloor.f32 %v812_v3  ;;  %v404_v14 = vmin.f32 %v401_v4, 255.0 }
  0x21   : > { %v1924_v16 = vfloor.f32 %v811_v5  ;;  %v1926_v17 = vfloor.f32 %v403_v6  ;;  %v1928_v18 = vfloor.f32 %v402_v7  ;;  %v916_v19 = vmin.f32 %v913_v8, 255.0 }
  0x22   : > { %327 = vrot.lane.b32.xlu1 %v1896_v43, %s1827_s22  ;;  %325 = vrot.lane.b32.xlu0 %v1898_v44, %s1827_s22  ;;  %v1934_v20 = vfloor.f32 %v404_v14  ;;  %v912_v21 = vmul.f32 255.0, %v1572_v9  ;;  %v911_v22 = vmul.f32 255.0, %v1571_v10  ;;  %v206_v23 = vrot.slane %v1887_v36, 7 }
  0x23   : > { %v1937_v24 = vfloor.f32 %v916_v19  ;;  %v208_v25 = vrot.slane %v1885_v35, 7  ;;  %v1941_v26 = vmul.f32 2.0, %v1887_v36  ;;  %v219_v27 = vrot.slane %v1887_v36, 1 }
  0x24   : > { %v915_v28 = vmax.f32 %v912_v21, 0.0  ;;  %v914_v29 = vmax.f32 %v911_v22, 0.0  ;;  %v220_v30 = vrot.slane %v1894_v42, 1  ;;  %v207_v31 = vrot.slane %v1894_v42, 7 }
  0x25   : > { %v212_v32 = vsel %vm3792_vm0, %v208_v25, %v206_v23  ;;  %v1949_v33 = vmul.f32 2.0, %v1894_v42  ;;  %v221_v34 = vrot.slane %v1885_v35, 1  ;;  %v1953_v38 = vmul.f32 2.0, %v1885_v35 }
  0x26   : > { %745 = vrot.lane.b32.xlu1 %v1905_v47, %s1827_s22  ;;  %743 = vrot.lane.b32.xlu0 %v1909_v52, %s1827_s22  ;;  %v918_v39 = vmin.f32 %v915_v28, 255.0  ;;  %v917_v40 = vmin.f32 %v914_v29, 255.0  ;;  %v216_v41 = vadd.f32 %v1941_v26, %v212_v32  ;;  %v224_v45 = vsel %vm3791_vm1, %v219_v27, %v220_v30 }
  0x27   : > { %v211_v46 = vsel %vm3792_vm0, %v206_v23, %v207_v31  ;;  %v223_v48 = vsel %vm3791_vm1, %v220_v30, %v221_v34  ;;  %v210_v49 = vsel %vm3792_vm0, %v207_v31, %v208_v25  ;;  %v225_v50 = vsel %vm3791_vm1, %v221_v34, %v219_v27 }
  0x28   : > { %v1970_v51 = vfloor.f32 %v918_v39  ;;  %v1972_v53 = vfloor.f32 %v917_v40  ;;  %v1974_v54 = vadd.f32 %v224_v45, %v216_v41  ;;  %v217_v55 = vadd.f32 %v1949_v33, %v211_v46 }
  0x29   : > { %v218_v56 = vadd.f32 %v1953_v38, %v210_v49  ;;  %v302_v57 = vrot.slane %v1889_v37, 7  ;;  %v304_v58 = vrot.slane %v1896_v43, 7  ;;  %v1981_v59 = vmul.f32 2.0, %v1889_v37 }
  0x2a   : > { %837 = vrot.lane.b32.xlu1 %v1918_v11, %s1827_s22  ;;  %747 = vrot.lane.b32.xlu0 %v1920_v12, %s1827_s22  ;;  %v1987_v60 = vadd.f32 %v223_v48, %v217_v55  ;;  %v314_v61 = vrot.slane %v1889_v37, 1  ;;  %v315_v62 = vrot.slane %v1898_v44, 1  ;;  %v303_v63 = vrot.slane %v1898_v44, 7 }
  0x2b   : > { %v1992_v1 = vadd.f32 %v225_v50, %v218_v56  ;;  %v307_v2 = vsel %vm3792_vm0, %v304_v58, %v302_v57  ;;  %v1997_v3 = vmul.f32 2.0, %v1898_v44  ;;  %v316_v4 = vrot.slane %v1896_v43, 1 }
  0x2c   : > { %v311_v5 = vadd.f32 %v1981_v59, %v307_v2  ;;  %v318_v6 = vsel %vm3791_vm1, %v314_v61, %v315_v62  ;;  %v306_v7 = vsel %vm3792_vm0, %v302_v57, %v303_v63  ;;  %v305_v8 = vsel %vm3792_vm0, %v303_v63, %v304_v58 }
  0x2d   : > { %v312_v9 = vadd.f32 %v1997_v3, %v306_v7  ;;  %v317_v10 = vsel %vm3791_vm1, %v315_v62, %v316_v4  ;;  %v2011_v14 = vmul.f32 2.0, %v1896_v43  ;;  %v319_v19 = vsel %vm3791_vm1, %v316_v4, %v314_v61 }
  0x2e   : > { %841 = vrot.lane.b32.xlu1 %v1922_v13, %s1827_s22  ;;  %839 = vrot.lane.b32.xlu0 %v1924_v16, %s1827_s22  ;;  %v2019_v21 = vadd.f32 %v318_v6, %v311_v5  ;;  %v722_v22 = vrot.slane %v1909_v52, 7  ;;  %v724_v23 = vrot.slane %v1920_v12, 7  ;;  %v2024_v25 = vmul.f32 2.0, %v1909_v52 }
  0x2f   : > { %v2026_v27 = vadd.f32 %v317_v10, %v312_v9  ;;  %v313_v28 = vadd.f32 %v2011_v14, %v305_v8  ;;  %v734_v29 = vrot.slane %v1909_v52, 1  ;;  %v735_v30 = vrot.slane %v1905_v47, 1 }
  0x30   : > { %v727_v31 = vsel %vm3792_vm0, %v724_v23, %v722_v22  ;;  %v723_v32 = vrot.slane %v1905_v47, 7  ;;  %v2035_v34 = vmul.f32 2.0, %v1905_v47  ;;  %v736_v39 = vrot.slane %v1920_v12, 1 }
  0x31   : > { %v2038_v40 = vadd.f32 %v319_v19, %v313_v28  ;;  %v731_v41 = vadd.f32 %v2024_v25, %v727_v31  ;;  %v738_v45 = vsel %vm3791_vm1, %v734_v29, %v735_v30  ;;  %v2044_v46 = vmul.f32 2.0, %v1920_v12 }
  0x32   : > { %240 = vrot.lane.b32.xlu1 %v1894_v42, %s1828_s23  ;;  %238 = vrot.lane.b32.xlu0 %v1887_v36, %s1828_s23  ;;  %v726_v48 = vsel %vm3792_vm0, %v722_v22, %v723_v32  ;;  %v737_v49 = vsel %vm3791_vm1, %v735_v30, %v736_v39  ;;  %v725_v50 = vsel %vm3792_vm0, %v723_v32, %v724_v23  ;;  %v816_v55 = vrot.slane %v1918_v11, 7 }
  0x33   : > { %v2057_v56 = vadd.f32 %v738_v45, %v731_v41  ;;  %v732_v57 = vadd.f32 %v2035_v34, %v726_v48  ;;  %v733_v42 = vadd.f32 %v2044_v46, %v725_v50  ;;  %v739_v36 = vsel %vm3791_vm1, %v736_v39, %v734_v29 }
  0x34   : > { %v818_v58 = vrot.slane %v1922_v13, 7  ;;  %v2065_v61 = vmul.f32 2.0, %v1918_v11  ;;  %v828_v62 = vrot.slane %v1918_v11, 1  ;;  %v829_v63 = vrot.slane %v1924_v16, 1 }
  0x35   : > { %v2069_v2 = vadd.f32 %v737_v49, %v732_v57  ;;  %v2071_v4 = vadd.f32 %v739_v36, %v733_v42  ;;  %v817_v5 = vrot.slane %v1924_v16, 7  ;;  %v2075_v6 = vmul.f32 2.0, %v1924_v16 }
  0x36   : > { %332 = vrot.lane.b32.xlu1 %v1889_v37, %s1828_s23  ;;  %242 = vrot.lane.b32.xlu0 %v1885_v35, %s1828_s23  ;;  %v821_v7 = vsel %vm3792_vm0, %v818_v58, %v816_v55  ;;  %v832_v8 = vsel %vm3791_vm1, %v828_v62, %v829_v63  ;;  %v830_v9 = vrot.slane %v1922_v13, 1  ;;  %v2087_v10 = vmul.f32 2.0, %v1922_v13 }
  0x37   : > { %v825_v19 = vadd.f32 %v2065_v61, %v821_v7  ;;  %v820_v22 = vsel %vm3792_vm0, %v816_v55, %v817_v5  ;;  %v819_v37 = vsel %vm3792_vm0, %v817_v5, %v818_v58  ;;  %v408_v35 = vrot.slane %v1928_v18, 7 }
  0x38   : > { %v826_v23 = vadd.f32 %v2075_v6, %v820_v22  ;;  %v831_v28 = vsel %vm3791_vm1, %v829_v63, %v830_v9  ;;  %v827_v29 = vadd.f32 %v2087_v10, %v819_v37  ;;  %v833_v30 = vsel %vm3791_vm1, %v830_v9, %v828_v62 }
  0x39   : > { %v2101_v31 = vadd.f32 %v832_v8, %v825_v19  ;;  %v410_v32 = vrot.slane %v1934_v20, 7  ;;  %v2105_v39 = vmul.f32 2.0, %v1928_v18  ;;  %v420_v41 = vrot.slane %v1928_v18, 1 }
  0x3a   : > { %336 = vrot.lane.b32.xlu1 %v1896_v43, %s1828_s23  ;;  %334 = vrot.lane.b32.xlu0 %v1898_v44, %s1828_s23  ;;  %v2112_v45 = vadd.f32 %v831_v28, %v826_v23  ;;  %v2114_v48 = vadd.f32 %v833_v30, %v827_v29  ;;  %v421_v49 = vrot.slane %v1926_v17, 1  ;;  %v409_v50 = vrot.slane %v1926_v17, 7 }
  0x3b   : > { %v413_v55 = vsel %vm3792_vm0, %v410_v32, %v408_v35  ;;  %v2121_v57 = vmul.f32 2.0, %v1926_v17  ;;  %v422_v42 = vrot.slane %v1934_v20, 1  ;;  %v2125_v43 = vmul.f32 2.0, %v1934_v20 }
  0x3c   : > { %v417_v44 = vadd.f32 %v2105_v39, %v413_v55  ;;  %v424_v36 = vsel %vm3791_vm1, %v420_v41, %v421_v49  ;;  %v412_v58 = vsel %vm3792_vm0, %v408_v35, %v409_v50  ;;  %v411_v62 = vsel %vm3792_vm0, %v409_v50, %v410_v32 }
  0x3d   : > { %v418_v63 = vadd.f32 %v2121_v57, %v412_v58  ;;  %v423_v5 = vsel %vm3791_vm1, %v421_v49, %v422_v42  ;;  %v419_v7 = vadd.f32 %v2125_v43, %v411_v62  ;;  %v425_v8 = vsel %vm3791_vm1, %v422_v42, %v420_v41 }
  0x3e   : > { %431 = vrot.lane.b32.xlu1 %v1926_v17, %s1827_s22  ;;  %429 = vrot.lane.b32.xlu0 %v1928_v18, %s1827_s22  ;;  %v2144_v9 = vadd.f32 %v424_v36, %v417_v44  ;;  %v922_v19 = vrot.slane %v1937_v24, 7  ;;  %v924_v22 = vrot.slane %v1970_v51, 7  ;;  %v2149_v37 = vmul.f32 2.0, %v1937_v24 }
  0x3f   : > { %v2151_v35 = vadd.f32 %v423_v5, %v418_v63  ;;  %v2153_v23 = vadd.f32 %v425_v8, %v419_v7  ;;  %v934_v28 = vrot.slane %v1937_v24, 1  ;;  %v935_v29 = vrot.slane %v1972_v53, 1 }
  0x40   : > { %v927_v30 = vsel %vm3792_vm0, %v924_v22, %v922_v19  ;;  %v923_v32 = vrot.slane %v1972_v53, 7  ;;  %v2161_v41 = vmul.f32 2.0, %v1972_v53  ;;  %v936_v49 = vrot.slane %v1970_v51, 1 }
  0x41   : > { %v931_v50 = vadd.f32 %v2149_v37, %v927_v30  ;;  %v938_v55 = vsel %vm3791_vm1, %v934_v28, %v935_v29  ;;  %v2168_v42 = vmul.f32 2.0, %v1970_v51 }
  0x42   : > { %752 = vrot.lane.b32.xlu1 %v1909_v52, %s1828_s23  ;;  %433 = vrot.lane.b32.xlu0 %v1934_v20, %s1827_s22  ;;  %v926_v44 = vsel %vm3792_vm0, %v922_v19, %v923_v32  ;;  %v937_v36 = vsel %vm3791_vm1, %v935_v29, %v936_v49  ;;  %v925_v58 = vsel %vm3792_vm0, %v923_v32, %v924_v22 }
  0x43   : > { %v2180_v62 = vadd.f32 %v938_v55, %v931_v50  ;;  %v932_v63 = vadd.f32 %v2161_v41, %v926_v44  ;;  %v933_v5 = vadd.f32 %v2168_v42, %v925_v58  ;;  %v939_v52 = vsel %vm3791_vm1, %v936_v49, %v934_v28 }
  0x45   : > { %v2186_v7 = vadd.f32 %v937_v36, %v932_v63  ;;  %v2188_v8 = vadd.f32 %v939_v52, %v933_v5 }
  0x46   : > { %756 = vrot.lane.b32.xlu1 %v1920_v12, %s1828_s23  ;;  %754 = vrot.lane.b32.xlu0 %v1905_v47, %s1828_s23 }
  0x4a   : > { %848 = vrot.lane.b32.xlu1 %v1924_v16, %s1828_s23  ;;  %846 = vrot.lane.b32.xlu0 %v1918_v11, %s1828_s23 }
  0x4e   : > { %943 = vrot.lane.b32.xlu1 %v1937_v24, %s1827_s22  ;;  %850 = vrot.lane.b32.xlu0 %v1922_v13, %s1828_s23 }
  0x52   : > { %947 = vrot.lane.b32.xlu1 %v1970_v51, %s1827_s22  ;;  %945 = vrot.lane.b32.xlu0 %v1972_v53, %s1827_s22 }
  0x56   : > { %440 = vrot.lane.b32.xlu1 %v1926_v17, %s1828_s23  ;;  %438 = vrot.lane.b32.xlu0 %v1928_v18, %s1828_s23 }
  0x5a   : > { %952 = vrot.lane.b32.xlu1 %v1937_v24, %s1828_s23  ;;  %442 = vrot.lane.b32.xlu0 %v1934_v20, %s1828_s23 }
  0x5e   : > { %956 = vrot.lane.b32.xlu1 %v1970_v51, %s1828_s23  ;;  %954 = vrot.lane.b32.xlu0 %v1972_v53, %s1828_s23 }
  0x62   : > { %247 = vrot.lane.b32.xlu0 %v1974_v54, %s1828_s23  ;;  %249 = vrot.lane.b32.xlu1 %v1987_v60, %s1828_s23 }
  0x66   : > { %251 = vrot.lane.b32.xlu0 %v1992_v1, %s1828_s23  ;;  %253 = vrot.lane.b32.xlu1 %v1974_v54, %s1827_s22 }
  0x6a   : > { %255 = vrot.lane.b32.xlu0 %v1987_v60, %s1827_s22  ;;  %257 = vrot.lane.b32.xlu1 %v1992_v1, %s1827_s22 }
  0x6e   : > { %341 = vrot.lane.b32.xlu0 %v2019_v21, %s1828_s23  ;;  %343 = vrot.lane.b32.xlu1 %v2026_v27, %s1828_s23 }
  0x72   : > { %345 = vrot.lane.b32.xlu0 %v2038_v40, %s1828_s23  ;;  %347 = vrot.lane.b32.xlu1 %v2019_v21, %s1827_s22 }
  0x76   : > { %349 = vrot.lane.b32.xlu0 %v2026_v27, %s1827_s22  ;;  %351 = vrot.lane.b32.xlu1 %v2038_v40, %s1827_s22 }
  0x7a   : > { %761 = vrot.lane.b32.xlu0 %v2057_v56, %s1828_s23  ;;  %763 = vrot.lane.b32.xlu1 %v2069_v2, %s1828_s23 }
  0x7e   : > { %765 = vrot.lane.b32.xlu0 %v2071_v4, %s1828_s23  ;;  %767 = vrot.lane.b32.xlu1 %v2057_v56, %s1827_s22 }
  0x82   : > { %769 = vrot.lane.b32.xlu0 %v2069_v2, %s1827_s22  ;;  %771 = vrot.lane.b32.xlu1 %v2071_v4, %s1827_s22 }
  0x86   : > { %855 = vrot.lane.b32.xlu0 %v2101_v31, %s1828_s23  ;;  %857 = vrot.lane.b32.xlu1 %v2112_v45, %s1828_s23 }
  0x8a   : > { %859 = vrot.lane.b32.xlu0 %v2114_v48, %s1828_s23  ;;  %861 = vrot.lane.b32.xlu1 %v2101_v31, %s1827_s22 }
  0x8c   : > { %v234_v47 = vpop.permute.xlu1 %233  ;;  %v230_v11 = vpop.permute.xlu0 %229 }
  0x8d   : > { %v235_v60 = vadd.f32 %v230_v11, %v1941_v26  ;;  %v237_v2 = vadd.f32 %v234_v47, %v1953_v38 }
  0x8e   : > { %863 = vrot.lane.b32.xlu0 %v2112_v45, %s1827_s22  ;;  %865 = vrot.lane.b32.xlu1 %v2114_v48, %s1827_s22 }
  0x90   : > { %v324_v12 = vpop.permute.xlu1 %323  ;;  %v232_v13 = vpop.permute.xlu0 %231 }
  0x91   : > { %v236_v1 = vadd.f32 %v232_v13, %v1949_v33  ;;  %v329_v4 = vadd.f32 %v324_v12, %v1981_v59 }
  0x92   : > { %447 = vrot.lane.b32.xlu0 %v2144_v9, %s1828_s23  ;;  %449 = vrot.lane.b32.xlu1 %v2151_v35, %s1828_s23 }
  0x94   : > { %v328_v16 = vpop.permute.xlu1 %327  ;;  %v326_v17 = vpop.permute.xlu0 %325 }
  0x95   : > { %v331_v28 = vadd.f32 %v328_v16, %v2011_v14  ;;  %v330_v29 = vadd.f32 %v326_v17, %v1997_v3 }
  0x96   : > { %451 = vrot.lane.b32.xlu0 %v2153_v23, %s1828_s23  ;;  %453 = vrot.lane.b32.xlu1 %v2144_v9, %s1827_s22 }
  0x98   : > { %v2274_v18 = vpop.permute.xlu1 %745  ;;  %v744_v20 = vpop.permute.xlu0 %743 }
  0x99   : > { %v749_v13 = vadd.f32 %v744_v20, %v2024_v25 }
  0x9a   : > { %455 = vrot.lane.b32.xlu0 %v2151_v35, %s1827_s22  ;;  %457 = vrot.lane.b32.xlu1 %v2153_v23, %s1827_s22 }
  0x9c   : > { %v2280_v24 = vpop.permute.xlu1 %837  ;;  %v2282_v51 = vpop.permute.xlu0 %747 }
  0x9e   : > { %961 = vrot.lane.b32.xlu0 %v2180_v62, %s1828_s23  ;;  %963 = vrot.lane.b32.xlu1 %v2186_v7, %s1828_s23 }
  0xa0   : > { %v2288_v53 = vpop.permute.xlu1 %841  ;;  %v2290_v54 = vpop.permute.xlu0 %839 }
  0xa2   : > { %965 = vrot.lane.b32.xlu0 %v2188_v8, %s1828_s23  ;;  %967 = vrot.lane.b32.xlu1 %v2180_v62, %s1827_s22 }
  0xa4   : > { %v241_v21 = vpop.permute.xlu1 %240  ;;  %v239_v27 = vpop.permute.xlu0 %238 }
  0xa5   : > { %v245_v40 = vadd.f32 %v241_v21, %v236_v1  ;;  %v244_v56 = vadd.f32 %v239_v27, %v235_v60 }
  0xa6   : > { %969 = vrot.lane.b32.xlu0 %v2186_v7, %s1827_s22  ;;  %971 = vrot.lane.b32.xlu1 %v2188_v8, %s1827_s22 }
  0xa7   : > { %v263_v31 = vrot.slane %v245_v40, 1  ;;  %v269_v45 = vrot.slane %v245_v40, 7  ;;  %v262_v48 = vrot.slane %v244_v56, 1  ;;  %v268_v26 = vrot.slane %v244_v56, 7 }
  0xa8   : > { %v333_v9 = vpop.permute.xlu1 %332  ;;  %v243_v33 = vpop.permute.xlu0 %242 }
  0xa9   : > { %v266_v19 = vsel %vm3791_vm1, %v262_v48, %v263_v31  ;;  %v272_v38 = vsel %vm3792_vm0, %v268_v26, %v269_v45  ;;  %v338_v22 = vadd.f32 %v333_v9, %v329_v4  ;;  %v246_v59 = vadd.f32 %v243_v33, %v237_v2 }
  0xab   : > { %v264_v35 = vrot.slane %v246_v59, 1  ;;  %v270_v23 = vrot.slane %v246_v59, 7  ;;  %v356_v63 = vrot.slane %v338_v22, 1  ;;  %v362_v5 = vrot.slane %v338_v22, 7 }
  0xac   : > { %v337_v30 = vpop.permute.xlu1 %336  ;;  %v335_v32 = vpop.permute.xlu0 %334 }
  0xad   : > { %v265_v49 = vsel %vm3791_vm1, %v263_v31, %v264_v35  ;;  %v267_v50 = vsel %vm3791_vm1, %v264_v35, %v262_v48  ;;  %v271_v55 = vsel %vm3792_vm0, %v269_v45, %v270_v23  ;;  %v273_v44 = vsel %vm3792_vm0, %v270_v23, %v268_v26 }
  0xae   : > { %v2318_v36 = vsub.f32 %v266_v19, %v273_v44  ;;  %v2320_v58 = vsub.f32 %v265_v49, %v272_v38  ;;  %v2322_v14 = vsub.f32 %v267_v50, %v271_v55  ;;  %v340_v3 = vadd.f32 %v337_v30, %v331_v28 }
  0xaf   : > { %v339_v62 = vadd.f32 %v335_v32, %v330_v29  ;;  %v750_v31 = vadd.f32 %v2274_v18, %v2035_v34  ;;  %v751_v45 = vadd.f32 %v2282_v51, %v2044_v46  ;;  %v843_v28 = vadd.f32 %v2280_v24, %v2065_v61 }
  0xb0   : > { %v358_v52 = vrot.slane %v340_v3, 1  ;;  %v364_v7 = vrot.slane %v340_v3, 7  ;;  %v2324_v8 = vpop.permute.xlu1 %431  ;;  %v2326_v47 = vpop.permute.xlu0 %429  ;;  %v844_v29 = vadd.f32 %v2290_v54, %v2075_v6  ;;  %v845_v49 = vadd.f32 %v2288_v53, %v2087_v10 }
  0xb1   : > { %v357_v11 = vrot.slane %v339_v62, 1  ;;  %v363_v12 = vrot.slane %v339_v62, 7 }
  0xb2   : > { %v361_v16 = vsel %vm3791_vm1, %v358_v52, %v356_v63  ;;  %v367_v17 = vsel %vm3792_vm0, %v364_v7, %v362_v5 }
  0xb3   : > { %v359_v60 = vsel %vm3791_vm1, %v357_v11, %v358_v52  ;;  %v360_v1 = vsel %vm3791_vm1, %v356_v63, %v357_v11  ;;  %v365_v21 = vsel %vm3792_vm0, %v363_v12, %v364_v7  ;;  %v366_v27 = vsel %vm3792_vm0, %v362_v5, %v363_v12 }
  0xb4   : > { %v2341_v40 = vsub.f32 %v360_v1, %v367_v17  ;;  %v2343_v25 = vsub.f32 %v359_v60, %v366_v27  ;;  %v2345_v20 = vsub.f32 %v361_v16, %v365_v21  ;;  %v753_v56 = vpop.permute.xlu1 %752  ;;  %v434_v2 = vpop.permute.xlu0 %433 }
  0xb5   : > { %v758_v4 = vadd.f32 %v753_v56, %v749_v13 }
  0xb7   : > { %v776_v19 = vrot.slane %v758_v4, 1  ;;  %v782_v38 = vrot.slane %v758_v4, 7 }
  0xb8   : > { %v757_v48 = vpop.permute.xlu1 %756  ;;  %v755_v26 = vpop.permute.xlu0 %754 }
  0xb9   : > { %v760_v9 = vadd.f32 %v757_v48, %v751_v45  ;;  %v759_v33 = vadd.f32 %v755_v26, %v750_v31  ;;  %v436_v45 = vadd.f32 %v2324_v8, %v2121_v57  ;;  %v435_v48 = vadd.f32 %v2326_v47, %v2105_v39 }
  0xbb   : > { %v778_v22 = vrot.slane %v760_v9, 1  ;;  %v784_v59 = vrot.slane %v760_v9, 7  ;;  %v777_v35 = vrot.slane %v759_v33, 1  ;;  %v783_v23 = vrot.slane %v759_v33, 7 }
  0xbc   : > { %v849_v34 = vpop.permute.xlu1 %848  ;;  %v847_v18 = vpop.permute.xlu0 %846 }
  0xbd   : > { %v781_v46 = vsel %vm3791_vm1, %v778_v22, %v776_v19  ;;  %v787_v51 = vsel %vm3792_vm0, %v784_v59, %v782_v38  ;;  %v779_v30 = vsel %vm3791_vm1, %v777_v35, %v778_v22  ;;  %v780_v32 = vsel %vm3791_vm1, %v776_v19, %v777_v35 }
  0xbe   : > { %v785_v61 = vsel %vm3792_vm0, %v783_v23, %v784_v59  ;;  %v786_v6 = vsel %vm3792_vm0, %v782_v38, %v783_v23  ;;  %v2367_v24 = vsub.f32 %v780_v32, %v787_v51  ;;  %v853_v54 = vadd.f32 %v849_v34, %v844_v29 }
  0xbf   : > { %v2371_v50 = vsub.f32 %v779_v30, %v786_v6  ;;  %v2373_v55 = vsub.f32 %v781_v46, %v785_v61  ;;  %v852_v44 = vadd.f32 %v847_v18, %v843_v28  ;;  %v437_v38 = vadd.f32 %v434_v2, %v2125_v43 }
  0xc0   : > { %v871_v3 = vrot.slane %v853_v54, 1  ;;  %v877_v62 = vrot.slane %v853_v54, 7  ;;  %v944_v63 = vpop.permute.xlu1 %943  ;;  %v851_v5 = vpop.permute.xlu0 %850 }
  0xc1   : > { %v870_v52 = vrot.slane %v852_v44, 1  ;;  %v876_v7 = vrot.slane %v852_v44, 7  ;;  %v854_v11 = vadd.f32 %v851_v5, %v845_v49  ;;  %v949_v22 = vadd.f32 %v944_v63, %v2149_v37 }
  0xc3   : > { %v874_v12 = vsel %vm3791_vm1, %v870_v52, %v871_v3  ;;  %v880_v13 = vsel %vm3792_vm0, %v876_v7, %v877_v62  ;;  %v872_v16 = vrot.slane %v854_v11, 1  ;;  %v878_v10 = vrot.slane %v854_v11, 7 }
  0xc4   : > { %v948_v53 = vpop.permute.xlu1 %947  ;;  %v946_v17 = vpop.permute.xlu0 %945 }
  0xc5   : > { %v873_v60 = vsel %vm3791_vm1, %v871_v3, %v872_v16  ;;  %v875_v1 = vsel %vm3791_vm1, %v872_v16, %v870_v52  ;;  %v879_v21 = vsel %vm3792_vm0, %v877_v62, %v878_v10  ;;  %v881_v27 = vsel %vm3792_vm0, %v878_v10, %v876_v7 }
  0xc6   : > { %v2387_v56 = vsub.f32 %v874_v12, %v881_v27  ;;  %v2389_v4 = vsub.f32 %v873_v60, %v880_v13  ;;  %v2391_v31 = vsub.f32 %v875_v1, %v879_v21  ;;  %v951_v43 = vadd.f32 %v948_v53, %v2168_v42 }
  0xc7   : > { %v950_v37 = vadd.f32 %v946_v17, %v2161_v41 }
  0xc8   : > { %v441_v26 = vpop.permute.xlu1 %440  ;;  %v439_v9 = vpop.permute.xlu0 %438 }
  0xc9   : > { %v445_v33 = vadd.f32 %v441_v26, %v436_v45  ;;  %v444_v19 = vadd.f32 %v439_v9, %v435_v48 }
  0xcb   : > { %v463_v59 = vrot.slane %v445_v33, 1  ;;  %v469_v35 = vrot.slane %v445_v33, 7  ;;  %v462_v23 = vrot.slane %v444_v19, 1  ;;  %v468_v28 = vrot.slane %v444_v19, 7 }
  0xcc   : > { %v953_v29 = vpop.permute.xlu1 %952  ;;  %v443_v34 = vpop.permute.xlu0 %442 }
  0xcd   : > { %v466_v57 = vsel %vm3791_vm1, %v462_v23, %v463_v59  ;;  %v472_v39 = vsel %vm3792_vm0, %v468_v28, %v469_v35  ;;  %v958_v8 = vadd.f32 %v953_v29, %v949_v22  ;;  %v446_v47 = vadd.f32 %v443_v34, %v437_v38 }
  0xce   : > { %v280_v34 = vand.u32 2147483647, %v2318_v36 }
  0xcf   : > { %v464_v18 = vrot.slane %v446_v47, 1  ;;  %v470_v46 = vrot.slane %v446_v47, 7  ;;  %v976_v3 = vrot.slane %v958_v8, 1  ;;  %v982_v62 = vrot.slane %v958_v8, 7 }
  0xd0   : > { %v957_v2 = vpop.permute.xlu1 %956  ;;  %v955_v51 = vpop.permute.xlu0 %954 }
  0xd1   : > { %v465_v30 = vsel %vm3791_vm1, %v463_v59, %v464_v18  ;;  %v467_v32 = vsel %vm3791_vm1, %v464_v18, %v462_v23  ;;  %v471_v61 = vsel %vm3792_vm0, %v469_v35, %v470_v46  ;;  %v473_v6 = vsel %vm3792_vm0, %v470_v46, %v468_v28 }
  0xd2   : > { %v2413_v54 = vsub.f32 %v466_v57, %v473_v6  ;;  %v2415_v49 = vsub.f32 %v465_v30, %v472_v39  ;;  %v2417_v42 = vsub.f32 %v467_v32, %v471_v61  ;;  %v960_v41 = vadd.f32 %v957_v2, %v951_v43 }
  0xd3   : > { %v959_v44 = vadd.f32 %v955_v51, %v950_v37  ;;  %v374_v57 = vand.u32 2147483647, %v2341_v40  ;;  %v281_v30 = vand.u32 2147483647, %v2320_v58  ;;  %v282_v32 = vand.u32 2147483647, %v2322_v14 }
  0xd4   : > { %v978_v63 = vrot.slane %v960_v41, 1  ;;  %v984_v5 = vrot.slane %v960_v41, 7  ;;  %v248_v52 = vpop.permute.xlu0 %247  ;;  %v250_v7 = vpop.permute.xlu1 %249  ;;  %v375_v61 = vand.u32 2147483647, %v2343_v25  ;;  %v376_v41 = vand.u32 2147483647, %v2345_v20 }
  0xd5   : > { %v977_v11 = vrot.slane %v959_v44, 1  ;;  %v983_v12 = vrot.slane %v959_v44, 7 }
  0xd6   : > { %v981_v13 = vsel %vm3791_vm1, %v978_v63, %v976_v3  ;;  %v987_v16 = vsel %vm3792_vm0, %v984_v5, %v982_v62 }
  0xd7   : > { %v979_v10 = vsel %vm3791_vm1, %v977_v11, %v978_v63  ;;  %v980_v53 = vsel %vm3791_vm1, %v976_v3, %v977_v11  ;;  %v985_v17 = vsel %vm3792_vm0, %v983_v12, %v984_v5  ;;  %v986_v60 = vsel %vm3792_vm0, %v982_v62, %v983_v12 }
  0xd8   : > { %v2431_v1 = vsub.f32 %v980_v53, %v987_v16  ;;  %v2433_v21 = vsub.f32 %v979_v10, %v986_v60  ;;  %v2435_v27 = vsub.f32 %v981_v13, %v985_v17  ;;  %v252_v45 = vpop.permute.xlu0 %251  ;;  %v254_v48 = vpop.permute.xlu1 %253 }
  0xd9   : > { %v259_v33 = vsub.f32 %v248_v52, %v254_v48 }
  0xdb   : > { %v277_v22 = vand.u32 2147483647, %v259_v33 }
  0xdc   : > { %v256_v26 = vpop.permute.xlu0 %255  ;;  %v258_v9 = vpop.permute.xlu1 %257 }
  0xdd   : > { %v260_v59 = vsub.f32 %v250_v7, %v256_v26  ;;  %v261_v28 = vsub.f32 %v252_v45, %v258_v9  ;;  %v283_v8 = vadd.f32 %v280_v34, %v277_v22 }
  0xdf   : > { %v278_v47 = vand.u32 2147483647, %v260_v59  ;;  %v279_v43 = vand.u32 2147483647, %v261_v28 }
  0xe0   : > { %v342_v19 = vpop.permute.xlu0 %341  ;;  %v344_v38 = vpop.permute.xlu1 %343 }
  0xe1   : > { %v284_v7 = vadd.f32 %v281_v30, %v278_v47  ;;  %v285_v11 = vadd.f32 %v282_v32, %v279_v43  ;;  %v795_v43 = vand.u32 2147483647, %v2371_v50  ;;  %v890_v30 = vand.u32 2147483647, %v2391_v31 }
  0xe4   : > { %v346_v35 = vpop.permute.xlu0 %345  ;;  %v348_v23 = vpop.permute.xlu1 %347 }
  0xe5   : > { %v353_v29 = vsub.f32 %v342_v19, %v348_v23 }
  0xe7   : > { %v371_v39 = vand.u32 2147483647, %v353_v29 }
  0xe8   : > { %v350_v18 = vpop.permute.xlu0 %349  ;;  %v352_v46 = vpop.permute.xlu1 %351 }
  0xe9   : > { %v377_v37 = vadd.f32 %v374_v57, %v371_v39  ;;  %v354_v2 = vsub.f32 %v344_v38, %v350_v18  ;;  %v355_v51 = vsub.f32 %v346_v35, %v352_v46  ;;  %v167_v39 = vand.u32 127, %v162_v0 }
  0xeb   : > { %vm380_vm2 = vcmp.gt.f32.partialorder %v377_v37, %v283_v8  ;;  %v372_v6 = vand.u32 2147483647, %v354_v2  ;;  %v373_v44 = vand.u32 2147483647, %v355_v51  ;;  %vm177_vm7 = vcmp.ge.s32.totalorder %v167_v39, 1 }
  0xec   : > { %v2443_v3 = vsel %vm380_vm2, %v353_v29, %v259_v33  ;;  %v2447_v62 = vsel %vm380_vm2, %v2341_v40, %v2318_v36  ;;  %v762_v63 = vpop.permute.xlu0 %761  ;;  %v764_v5 = vpop.permute.xlu1 %763  ;;  %v2449_v52 = vsel %vm380_vm2, %v377_v37, %v283_v8  ;;  %v796_v37 = vand.u32 2147483647, %v2373_v55  ;;  %vm178_vm11 = vmand %vm168_vm6, %vm177_vm7 }
  0xed   : > { %v378_v12 = vadd.f32 %v375_v61, %v372_v6  ;;  %v379_v13 = vadd.f32 %v376_v41, %v373_v44  ;;  %vm181_vm10 = vcmp.le.s32.totalorder %v167_v39, 16 }
  0xee   : > { %vm182_vm12 = vmand %vm178_vm11, %vm181_vm10 }
  0xef   : > { %vm381_vm3 = vcmp.gt.f32.partialorder %v378_v12, %v284_v7  ;;  %vm382_vm4 = vcmp.gt.f32.partialorder %v379_v13, %v285_v11  ;;  %vm183_vm2 = vmand %vm177_vm7, %vm181_vm10 }
  0xf0   : > { %v2451_v16 = vsel %vm381_vm3, %v354_v2, %v260_v59  ;;  %v2455_v10 = vsel %vm381_vm3, %v2343_v25, %v2320_v58  ;;  %v2457_v53 = vsel %vm382_vm4, %v355_v51, %v261_v28  ;;  %v2461_v36 = vsel %vm382_vm4, %v2345_v20, %v2322_v14  ;;  %v766_v40 = vpop.permute.xlu0 %765  ;;  %v768_v17 = vpop.permute.xlu1 %767 }
  0xf1   : > { %v2463_v60 = vsel %vm381_vm3, %v378_v12, %v284_v7  ;;  %v2465_v45 = vsel %vm382_vm4, %v379_v13, %v285_v11  ;;  %v773_v9 = vsub.f32 %v762_v63, %v768_v17  ;;  %v794_v14 = vand.u32 2147483647, %v2367_v24 }
  0xf2   : > { %v888_v20 = vand.u32 2147483647, %v2387_v56  ;;  %v889_v2 = vand.u32 2147483647, %v2389_v4 }
  0xf3   : > { %v791_v38 = vand.u32 2147483647, %v773_v9 }
  0xf4   : > { %v770_v48 = vpop.permute.xlu0 %769  ;;  %v772_v26 = vpop.permute.xlu1 %771 }
  0xf5   : > { %v774_v58 = vsub.f32 %v764_v5, %v770_v48  ;;  %v775_v59 = vsub.f32 %v766_v40, %v772_v26  ;;  %v2469_v28 = vadd.f32 %v794_v14, %v791_v38 }
  0xf7   : > { %v792_v29 = vand.u32 2147483647, %v774_v58  ;;  %v793_v8 = vand.u32 2147483647, %v775_v59 }
  0xf8   : > { %v856_v33 = vpop.permute.xlu0 %855  ;;  %v858_v19 = vpop.permute.xlu1 %857 }
  0xf9   : > { %v2493_v44 = vadd.f32 %v795_v43, %v792_v29  ;;  %v2495_v63 = vadd.f32 %v796_v37, %v793_v8 }
  0xfc   : > { %v860_v25 = vpop.permute.xlu0 %859  ;;  %v862_v22 = vpop.permute.xlu1 %861 }
  0xfd   : > { %v867_v35 = vsub.f32 %v856_v33, %v862_v22 }
  0xff   : > { %v885_v23 = vand.u32 2147483647, %v867_v35 }
 0x100   : > { %v864_v34 = vpop.permute.xlu0 %863  ;;  %v866_v57 = vpop.permute.xlu1 %865 }
 0x101   : > { %v2472_v47 = vadd.f32 %v888_v20, %v885_v23  ;;  %v868_v18 = vsub.f32 %v858_v19, %v864_v34  ;;  %v869_v46 = vsub.f32 %v860_v25, %v866_v57  ;;  %v481_v25 = vand.u32 2147483647, %v2415_v49 }
 0x102   : > { %v482_v23 = vand.u32 2147483647, %v2417_v42 }
 0x103   : > { %vm894_vm5 = vcmp.gt.f32.partialorder %v2472_v47, %v2469_v28  ;;  %v886_v51 = vand.u32 2147483647, %v868_v18  ;;  %v887_v32 = vand.u32 2147483647, %v869_v46 }
 0x104   : > { %v2483_v0 = vsel %vm894_vm5, %v867_v35, %v773_v9  ;;  %v2490_v61 = vsel %vm894_vm5, %v2387_v56, %v2367_v24  ;;  %v448_v6 = vpop.permute.xlu0 %447  ;;  %v450_v41 = vpop.permute.xlu1 %449  ;;  %v165_v24 = vadd.s32 16, %v1880_v15 }
 0x105   : > { %v2497_v5 = vadd.f32 %v889_v2, %v886_v51  ;;  %v2499_v7 = vadd.f32 %v890_v30, %v887_v32 }
 0x106   : > { %vm173_vm13 = vcmp.le.s32.totalorder %v165_v24, 16 }
 0x107   : > { %vm895_vm8 = vcmp.gt.f32.partialorder %v2497_v5, %v2493_v44  ;;  %vm3795_vm9 = vcmp.gt.f32.partialorder %v2499_v7, %v2495_v63  ;;  %vm2539_vm14 = vmand %vm173_vm13, %vm177_vm7 }
 0x108   : > { %v2509_v56 = vsel %vm895_vm8, %v868_v18, %v774_v58  ;;  %v2516_v11 = vsel %vm895_vm8, %v2389_v4, %v2371_v50  ;;  %v2521_v12 = vsel %vm3795_vm9, %v869_v46, %v775_v59  ;;  %v2528_v13 = vsel %vm3795_vm9, %v2391_v31, %v2373_v55  ;;  %v452_v40 = vpop.permute.xlu0 %451  ;;  %v454_v17 = vpop.permute.xlu1 %453  ;;  %vm184_vm6 = vmand %vm2539_vm14, %vm181_vm10 }
 0x109   : > { %v459_v50 = vsub.f32 %v448_v6, %v454_v17  ;;  %v480_v4 = vand.u32 2147483647, %v2413_v54  ;;  %v3829_v55 = vmov 0.0   ;;  %v3847_v6 = vmov 0 }
 0x10a   : > { %v2536_v31 = vsel %vm182_vm12, 1.0, %v3829_v55  ;;  %v2572_v39 = vsel %vm184_vm6, 1.0, %v3829_v55  ;;  %v3851_v58 = vmov 0 }
 0x10b   : > { %v477_v48 = vand.u32 2147483647, %v459_v50 }
 0x10c   : > { %v456_v26 = vpop.permute.xlu0 %455  ;;  %v458_v9 = vpop.permute.xlu1 %457 }
 0x10d   : > { %v483_v33 = vadd.f32 %v480_v4, %v477_v48  ;;  %v460_v19 = vsub.f32 %v450_v41, %v456_v26  ;;  %v461_v38 = vsub.f32 %v452_v40, %v458_v9  ;;  %v3849_v40 = vmov 0 }
 0x10f   : > { %vm486_vm15 = vcmp.gt.f32.partialorder %v483_v33, %v2449_v52  ;;  %v478_v22 = vand.u32 2147483647, %v460_v19  ;;  %v479_v59 = vand.u32 2147483647, %v461_v38 }
 0x110   : > { %v489_v35 = vsel %vm486_vm15, %v459_v50, %v2443_v3  ;;  %v2548_v14 = vsel %vm486_vm15, %v2413_v54, %v2447_v62  ;;  %v495_v20 = vsel %vm486_vm15, %v483_v33, %v2449_v52  ;;  %v962_v29 = vpop.permute.xlu0 %961  ;;  %v964_v34 = vpop.permute.xlu1 %963  ;;  %v3845_v54 = vmov 0 }
 0x111   : > { %v2555_v57 = vmul.f32 %v2536_v31, %v495_v20  ;;  %vm603_vm3 = vcmp.lt.f32.partialorder %v489_v35, 0.0  ;;  %vm606_vm4 = vcmp.lt.f32.partialorder %v2548_v14, 0.0  ;;  %v484_v3 = vadd.f32 %v481_v25, %v478_v22 }
 0x112   : > { %vm2561_vm11 = vmxor %vm603_vm3, %vm606_vm4  ;;  %v485_v62 = vadd.f32 %v482_v23, %v479_v59  ;;  %v2566_v52 = vsel %vm183_vm2, 1.0, %v3829_v55  ;;  %v501_v8 = vand.u32 2147483647, %v489_v35  ;;  %v995_v50 = vand.u32 2147483647, %v2433_v21 }
 0x113   : > { %v3846_v54 = vsel %vm2561_vm11, 4294967295, %v3845_v54  ;;  %507 = vrot.lane.b32.xlu0 %v2555_v57, %s1827_s22  ;;  %vm487_vm7 = vcmp.gt.f32.partialorder %v484_v3, %v2463_v60  ;;  %v3855_v35 = vmov 0  ;;  %v504_v20 = vand.u32 2147483647, %v2548_v14 }
 0x114   : > { %vm488_vm10 = vcmp.gt.f32.partialorder %v485_v62, %v2465_v45  ;;  %v966_v18 = vpop.permute.xlu0 %965  ;;  %v968_v46 = vpop.permute.xlu1 %967  ;;  %v490_v43 = vsel %vm487_vm7, %v460_v19, %v2451_v16  ;;  %v493_v37 = vsel %vm487_vm7, %v2415_v49, %v2455_v10  ;;  %v496_v2 = vsel %vm487_vm7, %v484_v3, %v2463_v60 }
 0x115   : > { %v2580_v51 = vsel %vm488_vm10, %v461_v38, %v2457_v53  ;;  %v2583_v30 = vmul.f32 %v2566_v52, %v496_v2  ;;  %v502_v32 = vand.u32 2147483647, %v490_v43  ;;  %vm604_vm12 = vcmp.lt.f32.partialorder %v490_v43, 0.0 }
 0x116   : > { %vm607_vm13 = vcmp.lt.f32.partialorder %v493_v37, 0.0  ;;  %v2591_v16 = vsel %vm488_vm10, %v2417_v42, %v2461_v36  ;;  %v497_v49 = vsel %vm488_vm10, %v485_v62, %v2465_v45  ;;  %vm605_vm15 = vcmp.lt.f32.partialorder %v2580_v51, 0.0 }
 0x117   : > { %vm2585_vm14 = vmxor %vm604_vm12, %vm607_vm13  ;;  %v556_v10 = vmul.f32 0.41421357, %v502_v32  ;;  %v562_v53 = vmul.f32 2.4142137, %v502_v32  ;;  %v2596_v60 = vmul.f32 %v2572_v39, %v497_v49  ;;  %vm608_vm2 = vcmp.lt.f32.partialorder %v2591_v16, 0.0  ;;  %509 = vrot.lane.b32.xlu1 %v2583_v30, %s1827_s22 }
 0x118   : > { %v3848_v6 = vsel %vm2585_vm14, 4294967295, %v3847_v6  ;;  %v970_v41 = vpop.permute.xlu0 %969  ;;  %v972_v24 = vpop.permute.xlu1 %971  ;;  %vm2601_vm3 = vmxor %vm605_vm15, %vm608_vm2  ;;  %v994_v42 = vand.u32 2147483647, %v2431_v1  ;;  %v973_v36 = vsub.f32 %v962_v29, %v968_v46  ;;  %v555_v17 = vmul.f32 0.41421357, %v501_v8 }
 0x119   : > { %v3850_v40 = vsel %vm2601_vm3, 4294967295, %v3849_v40  ;;  %v974_v45 = vsub.f32 %v964_v34, %v970_v41  ;;  %511 = vrot.lane.b32.xlu0 %v2596_v60, %s1827_s22  ;;  %v975_v4 = vsub.f32 %v966_v18, %v972_v24  ;;  %v505_v48 = vand.u32 2147483647, %v493_v37 }
 0x11a   : > { %v561_v26 = vmul.f32 2.4142137, %v501_v8  ;;  %v991_v9 = vand.u32 2147483647, %v973_v36  ;;  %v996_v19 = vand.u32 2147483647, %v2435_v27  ;;  %v903_v29 = vsel %vm894_vm5, %v2472_v47, %v2469_v28 }
 0x11b   : > { %v992_v33 = vand.u32 2147483647, %v974_v45  ;;  %v993_v38 = vand.u32 2147483647, %v975_v4  ;;  %513 = vrot.lane.b32.xlu1 %v2555_v57, %s1828_s23  ;;  %vm2612_vm4 = vcmp.lt.f32.partialorder %v505_v48, %v556_v10  ;;  %vm2616_vm6 = vcmp.gt.f32.partialorder %v505_v48, %v562_v53 }
 0x11c   : > { %v3852_v58 = vsel %vm2612_vm4, 4294967295, %v3851_v58  ;;  %v997_v22 = vadd.f32 %v994_v42, %v991_v9  ;;  %vm3793_vm7 = vmmov 1   ;;  %v503_v23 = vand.u32 2147483647, %v2580_v51 }
 0x11d   : > { %v998_v59 = vadd.f32 %v995_v50, %v992_v33  ;;  %vm2623_vm10 = vmxor %vm2612_vm4, %vm3793_vm7  ;;  %v904_v34 = vsel %vm895_vm8, %v2497_v5, %v2493_v44  ;;  %v999_v3 = vadd.f32 %v996_v19, %v993_v38  ;;  %515 = vrot.lane.b32.xlu0 %v2583_v30, %s1828_s23  ;;  %v3857_v28 = vmov 0 }
 0x11e   : > { %v3856_v35 = vsel %vm2623_vm10, 4294967295, %v3855_v35  ;;  %vm1000_vm13 = vcmp.gt.f32.partialorder %v997_v22, %v903_v29  ;;  %vm2648_vm5 = vmxor %vm2616_vm6, %vm3793_vm7  ;;  %vm2652_vm2 = vcmp.lt.f32.partialorder %v504_v20, %v555_v17  ;;  %v3859_v47 = vmov 0 }
 0x11f   : > { %vm1001_vm15 = vcmp.gt.f32.partialorder %v998_v59, %v904_v34  ;;  %v3858_v28 = vsel %vm2648_vm5, 4294967295, %v3857_v28  ;;  %v3860_v47 = vsel %vm2652_vm2, 4294967295, %v3859_v47  ;;  %vm2656_vm8 = vcmp.gt.f32.partialorder %v504_v20, %v561_v26  ;;  %517 = vrot.lane.b32.xlu1 %v2596_v60, %s1828_s23 }
 0x120   : > { %v3861_v44 = vmov 0  ;;  %v1003_v5 = vsel %vm1000_vm13, %v973_v36, %v2483_v0  ;;  %v1006_v14 = vsel %vm1000_vm13, %v2431_v1, %v2490_v61  ;;  %v1009_v62 = vsel %vm1000_vm13, %v997_v22, %v903_v29 }
 0x121   : > { %v3862_v44 = vsel %vm2656_vm8, 4294967295, %v3861_v44  ;;  %v1004_v8 = vsel %vm1001_vm15, %v974_v45, %v2509_v56  ;;  %v2671_v18 = vmul.f32 %v2536_v31, %v1009_v62  ;;  %vm1117_vm1 = vcmp.lt.f32.partialorder %v1003_v5, 0.0 }
 0x122   : > { %vm1120_vm0 = vcmp.lt.f32.partialorder %v1006_v14, 0.0  ;;  %v3863_v0 = vmov 0  ;;  %v1007_v1 = vsel %vm1001_vm15, %v2433_v21, %v2516_v11  ;;  %v1010_v61 = vsel %vm1001_vm15, %v998_v59, %v904_v34 }
 0x123   : > { %vm2673_vm7 = vmxor %vm1117_vm1, %vm1120_vm0  ;;  %v1016_v56 = vand.u32 2147483647, %v1004_v8  ;;  %vm1118_vm13 = vcmp.lt.f32.partialorder %v1004_v8, 0.0  ;;  %v2680_v46 = vmul.f32 %v2566_v52, %v1010_v61  ;;  %vm1121_vm9 = vcmp.lt.f32.partialorder %v1007_v1, 0.0  ;;  %1021 = vrot.lane.b32.xlu0 %v2671_v18, %s1827_s22 }
 0x124   : > { %v3864_v0 = vsel %vm2673_vm7, 4294967295, %v3863_v0  ;;  %vm3865_vm12 = vcmp.gt.f32.partialorder %v2499_v7, %v2495_v63  ;;  %v557_v43 = vmul.f32 0.41421357, %v503_v23  ;;  %v1015_v37 = vand.u32 2147483647, %v1003_v5  ;;  %vm2689_vm0 = vmxor %vm1118_vm13, %vm1121_vm9 }
 0x125   : > { %v905_v31 = vsel %vm3865_vm12, %v2499_v7, %v2495_v63  ;;  %v1070_v2 = vmul.f32 0.41421357, %v1016_v56  ;;  %v3866_v21 = vmov 0  ;;  %v1076_v11 = vmul.f32 2.4142137, %v1016_v56  ;;  %1023 = vrot.lane.b32.xlu1 %v2680_v46, %s1827_s22 }
 0x126   : > { %v3867_v21 = vsel %vm2689_vm0, 4294967295, %v3866_v21  ;;  %vm1002_vm1 = vcmp.gt.f32.partialorder %v999_v3, %v905_v31  ;;  %v3868_v49 = vmov 0  ;;  %v506_v10 = vand.u32 2147483647, %v2591_v16 }
 0x127   : > { %v1005_v52 = vsel %vm1002_vm1, %v975_v4, %v2521_v12  ;;  %v1008_v51 = vsel %vm1002_vm1, %v2435_v27, %v2528_v13  ;;  %v1011_v32 = vsel %vm1002_vm1, %v999_v3, %v905_v31  ;;  %v1019_v12 = vand.u32 2147483647, %v1007_v1 }
 0x128   : > { %v2699_v63 = vmul.f32 %v2572_v39, %v1011_v32  ;;  %v1017_v7 = vand.u32 2147483647, %v1005_v52  ;;  %vm1119_vm12 = vcmp.lt.f32.partialorder %v1005_v52, 0.0  ;;  %vm1122_vm9 = vcmp.lt.f32.partialorder %v1008_v51, 0.0 }
 0x129   : > { %vm2701_vm15 = vmxor %vm1119_vm12, %vm1122_vm9  ;;  %v563_v53 = vmul.f32 2.4142137, %v503_v23  ;;  %v1069_v41 = vmul.f32 0.41421357, %v1015_v37  ;;  %v1075_v27 = vmul.f32 2.4142137, %v1015_v37  ;;  %1027 = vrot.lane.b32.xlu1 %v2671_v18, %s1828_s23  ;;  %vm2710_vm13 = vcmp.lt.f32.partialorder %v506_v10, %v557_v43 }
 0x12a   : > { %v3869_v49 = vsel %vm2701_vm15, 4294967295, %v3868_v49  ;;  %1025 = vrot.lane.b32.xlu0 %v2699_v63, %s1827_s22  ;;  %v1071_v13 = vmul.f32 0.41421357, %v1017_v7  ;;  %v3870_v39 = vmov 0  ;;  %vm2714_vm1 = vcmp.lt.f32.partialorder %v1019_v12, %v1070_v2 }
 0x12b   : > { %v3871_v39 = vsel %vm2710_vm13, 4294967295, %v3870_v39  ;;  %v3872_v24 = vmov 0  ;;  %vm2718_vm12 = vcmp.gt.f32.partialorder %v1019_v12, %v1076_v11  ;;  %v3874_v16 = vmov 0 }
 0x12c   : > { %v3873_v24 = vsel %vm2714_vm1, 4294967295, %v3872_v24  ;;  %v3875_v16 = vsel %vm2718_vm12, 4294967295, %v3874_v16  ;;  %vm3876_vm9 = vmmov 1   ;;  %v3877_v42 = vmov 0 }
 0x12d   : > { %vm2725_vm15 = vmxor %vm2652_vm2, %vm3876_vm9  ;;  %v1018_v36 = vand.u32 2147483647, %v1006_v14  ;;  %v1020_v45 = vand.u32 2147483647, %v1008_v51  ;;  %v1077_v17 = vmul.f32 2.4142137, %v1017_v7  ;;  %1031 = vrot.lane.b32.xlu1 %v2699_v63, %s1828_s23  ;;  %vm2756_vm14 = vcmp.gt.f32.partialorder %v506_v10, %v563_v53 }
 0x12e   : > { %v3878_v42 = vsel %vm2725_vm15, 4294967295, %v3877_v42  ;;  %1029 = vrot.lane.b32.xlu0 %v2680_v46, %s1828_s23  ;;  %v3879_v50 = vmov 0  ;;  %v3881_v4 = vmov 0  ;;  %vm2748_vm0 = vmxor %vm2656_vm8, %vm3876_vm9  ;;  %v3883_v48 = vmov 0 }
 0x12f   : > { %vm2735_vm7 = vcmp.lt.f32.partialorder %v1018_v36, %v1069_v41  ;;  %vm2739_vm5 = vcmp.gt.f32.partialorder %v1018_v36, %v1075_v27  ;;  %v3884_v48 = vsel %vm2748_vm0, 4294967295, %v3883_v48  ;;  %vm2752_vm3 = vcmp.lt.f32.partialorder %v1020_v45, %v1071_v13  ;;  %vm2767_vm2 = vmxor %vm2714_vm1, %vm3876_vm9 }
 0x130   : > { %v3880_v50 = vsel %vm2735_vm7, 4294967295, %v3879_v50  ;;  %v3882_v4 = vsel %vm2739_vm5, 4294967295, %v3881_v4  ;;  %v3885_v26 = vmov 0  ;;  %v3887_v9 = vmov 0  ;;  %vm2782_vm11 = vmxor %vm2718_vm12, %vm3876_vm9 }
 0x131   : > { %v3886_v26 = vsel %vm2752_vm3, 4294967295, %v3885_v26  ;;  %v3888_v9 = vsel %vm2756_vm14, 4294967295, %v3887_v9  ;;  %v3889_v33 = vmov 0  ;;  %vm2771_vm8 = vcmp.gt.f32.partialorder %v1020_v45, %v1077_v17  ;;  %vm2793_vm1 = vmxor %vm2735_vm7, %vm3876_vm9 }
 0x132   : > { %v3890_v33 = vsel %vm2767_vm2, 4294967295, %v3889_v33  ;;  %v3891_v19 = vmov 0  ;;  %v3893_v38 = vmov 0  ;;  %v3895_v22 = vmov 0  ;;  %vm2804_vm12 = vmxor %vm2710_vm13, %vm3876_vm9 }
 0x133   : > { %v3892_v19 = vsel %vm2771_vm8, 4294967295, %v3891_v19  ;;  %v3894_v38 = vsel %vm2782_vm11, 4294967295, %v3893_v38  ;;  %v3896_v22 = vsel %vm2793_vm1, 4294967295, %v3895_v22  ;;  %v3897_v59 = vmov 0  ;;  %vm2811_vm0 = vmxor %vm2739_vm5, %vm3876_vm9 }
 0x134   : > { %v3898_v59 = vsel %vm2804_vm12, 4294967295, %v3897_v59  ;;  %v3899_v20 = vmov 0  ;;  %vm2826_vm13 = vmxor %vm2752_vm3, %vm3876_vm9  ;;  %v3901_v23 = vmov 0  ;;  %v3903_v29 = vmov 0 }
 0x135   : > { %v3900_v20 = vsel %vm2811_vm0, 4294967295, %v3899_v20  ;;  %v3902_v23 = vsel %vm2826_vm13, 4294967295, %v3901_v23  ;;  %vm2833_vm7 = vmxor %vm2756_vm14, %vm3876_vm9  ;;  %v3905_v34 = vmov 0  ;;  %v520_v3 = vrot.slane %v2583_v30, 7 }
 0x136   : > { %v3904_v29 = vsel %vm2833_vm7, 4294967295, %v3903_v29  ;;  %vm2848_vm0 = vmxor %vm2771_vm8, %vm3876_vm9  ;;  %v526_v5 = vrot.slane %v2583_v30, 1  ;;  %v527_v14 = vrot.slane %v2596_v60, 1  ;;  %v519_v62 = vrot.slane %v2555_v57, 7 }
 0x137   : > { %v3906_v34 = vsel %vm2848_vm0, 4294967295, %v3905_v34  ;;  %vm3907_vm4 = vcmp.lt.s32.totalorder %v1880_v15, 1  ;;  %vm3908_vm11 = vcmp.lt.s32.totalorder %v1880_v15, 7  ;;  %v521_v56 = vrot.slane %v2596_v60, 7 }
 0x138   : > { %v523_v1 = vsel %vm3907_vm4, %v519_v62, %v520_v3  ;;  %v528_v61 = vsel %vm3908_vm11, %v526_v5, %v527_v14  ;;  %v525_v31 = vrot.slane %v2555_v57, 1  ;;  %vm3909_vm8 = vmmov %vm3907_vm4  ;;  %v3836_v52 = vrot.slane %v2680_v46, 7 }
 0x139   : > { %vm577_vm3 = vcmp.gt.f32.partialorder %v2583_v30, %v523_v1  ;;  %vm580_vm0 = vcmp.ge.f32.partialorder %v2583_v30, %v528_v61  ;;  %v524_v37 = vsel %vm3909_vm8, %v521_v56, %v519_v62  ;;  %vm3910_vm4 = vmmov %vm3908_vm11  ;;  %v1040_v51 = vrot.slane %v2680_v46, 1 }
 0x13a   : > { %v529_v2 = vsel %vm3910_vm4, %v525_v31, %v526_v5  ;;  %vm583_vm11 = vmand %vm577_vm3, %vm580_vm0  ;;  %v3831_v32 = vrot.slane %v2699_v63, 1  ;;  %vm576_vm13 = vcmp.gt.f32.partialorder %v2555_v57, %v524_v37  ;;  %v1033_v10 = vrot.slane %v2671_v18, 7 }
 0x13b   : > { %vm579_vm7 = vcmp.ge.f32.partialorder %v2555_v57, %v529_v2  ;;  %vm3911_vm8 = vmand %vm2623_vm10, %vm2616_vm6  ;;  %vm3912_vm0 = vcmp.lt.s32.totalorder %v1880_v15, 1  ;;  %v3837_v41 = vrot.slane %v2699_v63, 7  ;;  %vm3915_vm6 = vcmp.lt.s32.totalorder %v1880_v15, 7 }
 0x13c   : > { %vm634_vm3 = vmand %vm3911_vm8, %vm583_vm11  ;;  %v1037_v53 = vsel %vm3912_vm0, %v1033_v10, %v3836_v52  ;;  %v1042_v25 = vsel %vm3915_vm6, %v1040_v51, %v3831_v32  ;;  %v3835_v36 = vrot.slane %v2671_v18, 1  ;;  %vm3916_vm0 = vnez %v3852_v58 }
 0x13d   : > { %vm2904_vm12 = vmand %vm576_vm13, %vm579_vm7  ;;  %vm1091_vm7 = vcmp.gt.f32.partialorder %v2680_v46, %v1037_v53  ;;  %v3917_v45 = vmov 0  ;;  %v3923_v1 = vmov 0  ;;  %v3951_v27 = vmov 0 }
 0x13e   : > { %v1043_v58 = vsel %vm3915_vm6, %v3835_v36, %v1040_v51  ;;  %vm3922_vm6 = vnez %v3860_v47 }
 0x13f   : > { %vm1093_vm5 = vcmp.ge.f32.partialorder %v2671_v18, %v1043_v58 }
 0x185   : > { %v2860_v8 = vpop.permute.xlu0 %507 }
 0x186   : > { %vm567_vm13 = vcmp.gt.f32.partialorder %v2555_v57, %v2860_v8 }
 0x189   : > { %v2870_v43 = vpop.permute.xlu1 %509 }
 0x18a   : > { %vm568_vm4 = vcmp.gt.f32.partialorder %v2583_v30, %v2870_v43 }
 0x18b   : > { %v2878_v11 = vpop.permute.xlu0 %511 }
 0x18d   : > { %v2885_v7 = vpop.permute.xlu1 %513 }
 0x18e   : > { %vm570_vm8 = vcmp.ge.f32.partialorder %v2555_v57, %v2885_v7  ;;  %v543_v53 = vrot.slane %v2885_v7, 7 }
 0x18f   : > { %v2888_v12 = vpop.permute.xlu0 %515 }
 0x190   : > { %vm571_vm14 = vcmp.ge.f32.partialorder %v2583_v30, %v2888_v12  ;;  %v550_v61 = vrot.slane %v2888_v12, 1  ;;  %v544_v47 = vrot.slane %v2888_v12, 7  ;;  %v538_v12 = vrot.slane %v2870_v43, 1 }
 0x191   : > { %vm574_vm11 = vmand %vm568_vm4, %vm571_vm14  ;;  %v2914_v13 = vpop.permute.xlu1 %517  ;;  %vm1094_vm14 = vcmp.ge.f32.partialorder %v2680_v46, %v1042_v25  ;;  %vm3919_vm4 = vcmp.lt.s32.totalorder %v1880_v15, 1 }
 0x192   : > { %vm625_vm10 = vmand %vm3916_vm0, %vm574_vm11  ;;  %v1038_v17 = vsel %vm3919_vm4, %v3837_v41, %v1033_v10  ;;  %v533_v10 = vrot.slane %v2878_v11, 7  ;;  %v545_v55 = vrot.slane %v2914_v13, 7  ;;  %v537_v41 = vrot.slane %v2860_v8, 1 }
 0x193   : > { %vm2922_vm9 = vmor %vm625_vm10, %vm634_vm3  ;;  %vm3920_vm10 = vnez %v3862_v44  ;;  %vm1090_vm4 = vcmp.gt.f32.partialorder %v2671_v18, %v1038_v17  ;;  %v549_v44 = vrot.slane %v2885_v7, 1  ;;  %v539_v7 = vrot.slane %v2878_v11, 1 }
 0x194   : > { %v3918_v45 = vsel %vm2922_vm9, 4294967295, %v3917_v45  ;;  %vm573_vm11 = vmand %vm567_vm13, %vm570_vm8  ;;  %v551_v17 = vrot.slane %v2914_v13, 1 }
 0x195   : > { %v2935_v5 = vpop.permute.xlu0 %1021  ;;  %vm3921_vm3 = vmand %vm2725_vm15, %vm3920_vm10 }
 0x196   : > { %vm633_vm0 = vmand %vm3921_vm3, %vm2904_vm12  ;;  %vm1081_vm3 = vcmp.gt.f32.partialorder %v2671_v18, %v2935_v5 }
 0x197   : > { %v2944_v62 = vpop.permute.xlu1 %1023  ;;  %vm1097_vm9 = vmand %vm1091_vm7, %vm1094_vm14  ;;  %vm3925_vm7 = vcmp.lt.s32.totalorder %v1880_v15, 1  ;;  %vm3926_vm14 = vnez %v3875_v16 }
 0x198   : > { %vm624_vm8 = vmand %vm3922_vm6, %vm573_vm11  ;;  %v522_v51 = vsel %vm3925_vm7, %v520_v3, %v521_v56  ;;  %v531_v3 = vrot.slane %v2860_v8, 7  ;;  %vm1082_vm7 = vcmp.gt.f32.partialorder %v2680_v46, %v2944_v62 }
 0x199   : > { %vm2950_vm13 = vmor %vm624_vm8, %vm633_vm0  ;;  %vm3930_vm0 = vnez %v3882_v4 }
 0x19a   : > { %v3924_v1 = vsel %vm2950_vm13, 4294967295, %v3923_v1  ;;  %vm1096_vm12 = vmand %vm1090_vm4, %vm1093_vm5 }
 0x19b   : > { %v2958_v2 = vpop.permute.xlu1 %1027  ;;  %vm3927_vm11 = vmand %vm2767_vm2, %vm3926_vm14 }
 0x19c   : > { %v2956_v37 = vpop.permute.xlu0 %1025  ;;  %vm2970_vm10 = vmand %vm3927_vm11, %vm1097_vm9  ;;  %vm1084_vm5 = vcmp.ge.f32.partialorder %v2671_v18, %v2958_v2  ;;  %vm3934_vm9 = vcmp.lt.s32.totalorder %v1880_v15, 7  ;;  %vm3938_vm11 = vnez %v3880_v50  ;;  %v3964_v50 = vmov 0 }
 0x19d   : > { %vm3931_vm4 = vmand %vm2793_vm1, %vm3930_vm0  ;;  %v530_v56 = vsel %vm3934_vm9, %v527_v14, %v525_v31  ;;  %v532_v31 = vrot.slane %v2870_v43, 7  ;;  %vm3941_vm1 = vnez %v3873_v24  ;;  %vm3942_vm0 = vcmp.lt.s32.totalorder %v1880_v15, 7 }
 0x19e   : > { %vm2984_vm6 = vmand %vm3931_vm4, %vm1096_vm12  ;;  %v540_v36 = vsel %vm3942_vm0, %v538_v12, %v539_v7  ;;  %v3944_v43 = vmov 0 }
 0x19f   : > { %vm3935_vm8 = vmmov %vm3934_vm9 }
 0x1a0   : > { %v553_v25 = vsel %vm3935_vm8, %v549_v44, %v550_v61  ;;  %v2997_v4 = vpop.permute.xlu0 %1029  ;;  %vm2999_vm12 = vmand %vm1081_vm3, %vm1084_vm5  ;;  %vm3939_vm5 = vcmp.lt.s32.totalorder %v1880_v15, 1  ;;  %vm581_vm8 = vcmp.ge.f32.partialorder %v2596_v60, %v530_v56  ;;  %v3948_v56 = vmov 0 }
 0x1a1   : > { %vm1085_vm14 = vcmp.ge.f32.partialorder %v2680_v46, %v2997_v4  ;;  %v536_v14 = vsel %vm3939_vm5, %v533_v10, %v531_v3  ;;  %vm3940_vm3 = vmmov %vm3939_vm5  ;;  %vm588_vm2 = vcmp.gt.f32.partialorder %v2555_v57, %v553_v25  ;;  %v4013_v25 = vrot.slane %v2671_v18, 1 }
 0x1a2   : > { %v547_v32 = vsel %vm3940_vm3, %v543_v53, %v544_v47  ;;  %vm1088_vm9 = vmand %vm1082_vm7, %vm1085_vm14  ;;  %vm585_vm7 = vcmp.gt.f32.partialorder %v2555_v57, %v536_v14 }
 0x1a3   : > { %vm1139_vm13 = vmand %vm3941_vm1, %vm1088_vm9  ;;  %vm572_vm9 = vcmp.ge.f32.partialorder %v2596_v60, %v2914_v13  ;;  %v3960_v13 = vmov 0  ;;  %vm3963_vm15 = vcmp.gt.f32.partialorder %v2583_v30, %v547_v32  ;;  %v3970_v32 = vmov 0 }
 0x1a4   : > { %vm3943_vm4 = vmmov %vm3942_vm0  ;;  %vm3947_vm0 = vcmp.gt.f32.partialorder %v2596_v60, %v522_v51 }
 0x1a5   : > { %v552_v52 = vsel %vm3943_vm4, %v550_v61, %v551_v17  ;;  %vm3028_vm5 = vmor %vm1139_vm13, %vm2970_vm10  ;;  %v554_v8 = vsel %vm3943_vm4, %v551_v17, %v549_v44  ;;  %v3956_v44 = vmov 0  ;;  %v4014_v17 = vrot.slane %v2699_v63, 1 }
 0x1a6   : > { %v3945_v43 = vsel %vm3028_vm5, 4294967295, %v3944_v43  ;;  %vm3946_vm1 = vmmov %vm3940_vm3  ;;  %vm3962_vm5 = vcmp.lt.s32.totalorder %v1880_v15, 1 }
 0x1a7   : > { %v548_v24 = vsel %vm3946_vm1, %v545_v55, %v543_v53  ;;  %vm3039_vm3 = vmand %vm3947_vm0, %vm581_vm8  ;;  %vm598_vm8 = vcmp.gt.f32.partialorder %v2583_v30, %v540_v36  ;;  %v3973_v36 = vmov 0 }
 0x1a8   : > { %v3949_v56 = vsel %vm3039_vm3, 4294967295, %v3948_v56  ;;  %vm3950_vm13 = vmmov %vm3946_vm1 }
 0x1a9   : > { %v535_v61 = vsel %vm3950_vm13, %v531_v3, %v532_v31  ;;  %vm3045_vm10 = vmand %vm585_vm7, %vm588_vm2  ;;  %v4061_v3 = vmov 0 }
 0x1aa   : > { %v3952_v27 = vsel %vm3045_vm10, 4294967295, %v3951_v27  ;;  %vm3953_vm1 = vmmov %vm3943_vm4  ;;  %vm3958_vm4 = vmmov 1  }
 0x1ab   : > { %v541_v51 = vsel %vm3953_vm1, %v537_v41, %v538_v12  ;;  %vm3954_vm0 = vmmov %vm3950_vm13  ;;  %vm589_vm13 = vcmp.gt.f32.partialorder %v2583_v30, %v552_v52  ;;  %vm3959_vm1 = vnez %v3846_v54  ;;  %v3967_v52 = vmov 0  ;;  %v3147_v54 = vpop.permute.xlu1 %1031 }
 0x1ac   : > { %v546_v53 = vsel %vm3954_vm0, %v544_v47, %v545_v55  ;;  %vm3955_vm2 = vmand %vm3938_vm11, %vm2999_vm12  ;;  %vm569_vm0 = vcmp.gt.f32.partialorder %v2596_v60, %v2878_v11  ;;  %v534_v55 = vsel %vm3962_vm5, %v532_v31, %v533_v10  ;;  %vm3966_vm11 = vnez %v3848_v6 }
 0x1ad   : > { %vm3066_vm7 = vmor %vm3955_vm2, %vm2984_vm6  ;;  %vm594_vm6 = vcmp.gt.f32.partialorder %v2555_v57, %v548_v24  ;;  %vm586_vm5 = vcmp.gt.f32.partialorder %v2583_v30, %v535_v61  ;;  %v3975_v10 = vmov 0  ;;  %v1045_v31 = vrot.slane %v2935_v5, 7 }
 0x1ae   : > { %v3957_v44 = vsel %vm3066_vm7, 4294967295, %v3956_v44  ;;  %vm3073_vm14 = vmxor %vm3959_vm1, %vm3958_vm4  ;;  %vm3969_vm7 = vcmp.lt.s32.totalorder %v1880_v15, 7  ;;  %v1046_v24 = vrot.slane %v2944_v62, 7 }
 0x1af   : > { %v3961_v13 = vsel %vm3073_vm14, 4294967295, %v3960_v13  ;;  %vm3083_vm12 = vmand %vm3963_vm15, %vm598_vm8  ;;  %v542_v11 = vsel %vm3969_vm7, %v539_v7, %v537_v41  ;;  %vm590_vm15 = vcmp.gt.f32.partialorder %v2596_v60, %v554_v8  ;;  %vm3972_vm8 = vnez %v3850_v40 }
 0x1b0   : > { %v3965_v50 = vsel %vm3083_vm12, 4294967295, %v3964_v50  ;;  %vm3091_vm2 = vmxor %vm3966_vm11, %vm3958_vm4  ;;  %vm587_vm7 = vcmp.gt.f32.partialorder %v2596_v60, %v534_v55  ;;  %vm599_vm12 = vcmp.gt.f32.partialorder %v2596_v60, %v542_v11  ;;  %v1057_v41 = vrot.slane %v2958_v2, 7 }
 0x1b1   : > { %v3968_v52 = vsel %vm3091_vm2, 4294967295, %v3967_v52  ;;  %vm3098_vm14 = vmand %vm569_vm0, %vm572_vm9  ;;  %vm597_vm2 = vcmp.gt.f32.partialorder %v2555_v57, %v541_v51  ;;  %vm596_vm9 = vcmp.gt.f32.partialorder %v2596_v60, %v546_v53  ;;  %v1053_v7 = vrot.slane %v2956_v37, 1 }
 0x1b2   : > { %v3971_v32 = vsel %vm3098_vm14, 4294967295, %v3970_v32  ;;  %vm3106_vm10 = vmxor %vm3972_vm8, %vm3958_vm4  ;;  %vm3982_vm8 = vnez %v3965_v50  ;;  %vm3983_vm14 = vnez %v3848_v6  ;;  %v1059_v6 = vrot.slane %v3147_v54, 7 }
 0x1b3   : > { %v3974_v36 = vsel %vm3106_vm10, 4294967295, %v3973_v36  ;;  %vm3111_vm11 = vmand %vm586_vm5, %vm589_vm13  ;;  %vm3978_vm5 = vnez %v3949_v56  ;;  %v4025_v8 = vmov 0  ;;  %v4040_v55 = vmov 0 }
 0x1b4   : > { %v3976_v10 = vsel %vm3111_vm11, 4294967295, %v3975_v10  ;;  %vm600_vm0 = vmand %vm594_vm6, %vm597_vm2  ;;  %vm3979_vm11 = vnez %v3898_v59  ;;  %vm3980_vm2 = vnez %v3888_v9  ;;  %v1058_v9 = vrot.slane %v2997_v4, 7 }
 0x1b5   : > { %vm593_vm3 = vmand %vm587_vm7, %vm590_vm15  ;;  %vm3984_vm15 = vnez %v3850_v40  ;;  %v4043_v11 = vmov 0  ;;  %v4050_v40 = vmov 0 }
 0x1b6   : > { %vm602_vm10 = vmand %vm596_vm9, %vm599_vm12  ;;  %vm3985_vm12 = vnez %v3952_v27 }
 0x1b7   : > { %vm612_vm13 = vmand %vm3959_vm1, %vm600_vm0  ;;  %vm3986_vm1 = vnez %v3961_v13 }
 0x1b8   : > { %vm3981_vm6 = vmand %vm3979_vm11, %vm3980_vm2  ;;  %vm3987_vm2 = vnez %v3976_v10  ;;  %vm3988_vm11 = vnez %v3968_v52 }
 0x1b9   : > { %vm635_vm4 = vmand %vm3981_vm6, %vm3978_vm5  ;;  %vm3989_vm6 = vnez %v3974_v36 }
 0x1ba   : > { %vm613_vm7 = vmand %vm3983_vm14, %vm3982_vm8 }
 0x1bb   : > { %vm614_vm9 = vmand %vm3984_vm15, %vm602_vm10 }
 0x1bc   : > { %vm618_vm0 = vmand %vm3986_vm1, %vm3985_vm12  ;;  %vm3990_vm1 = vnez %v3871_v39  ;;  %vm3991_vm12 = vnez %v3971_v32  ;;  %v1052_v39 = vrot.slane %v2944_v62, 1 }
 0x1bd   : > { %vm619_vm5 = vmand %vm3988_vm11, %vm3987_vm2 }
 0x1be   : > { %vm620_vm8 = vmand %vm3989_vm6, %vm593_vm3  ;;  %vm3995_vm3 = vnez %v3878_v42  ;;  %v4005_v42 = vrot.slane %v2699_v63, 7 }
 0x1bf   : > { %vm621_vm14 = vmor %vm612_vm13, %vm618_vm0  ;;  %vm3996_vm13 = vnez %v3884_v48  ;;  %vm4001_vm0 = vnez %v3858_v28  ;;  %v4006_v48 = vrot.slane %v2680_v46, 7  ;;  %v1063_v28 = vrot.slane %v2958_v2, 1 }
 0x1c0   : > { %vm622_vm10 = vmor %vm613_vm7, %vm619_vm5  ;;  %v1047_v2 = vrot.slane %v2956_v37, 7 }
 0x1c1   : > { %vm623_vm15 = vmor %vm614_vm9, %vm620_vm8  ;;  %vm651_vm8 = vcmp.gt.f32.partialorder %v2555_v57, 75.0 }
 0x1c2   : > { %vm3992_vm2 = vmand %vm3990_vm1, %vm3991_vm12  ;;  %vm4009_vm1 = vnez %v3904_v29  ;;  %v1065_v29 = vrot.slane %v3147_v54, 1 }
 0x1c3   : > { %vm3155_vm11 = vmor %vm3992_vm2, %vm635_vm4  ;;  %vm4000_vm4 = vnez %v3856_v35  ;;  %v1064_v35 = vrot.slane %v2997_v4, 1  ;;  %v1051_v4 = vrot.slane %v2935_v5, 1 }
 0x1c4   : > { %vm3997_vm7 = vmand %vm3995_vm3, %vm3996_vm13  ;;  %vm4015_vm3 = vcmp.lt.s32.totalorder %v1880_v15, 7 }
 0x1c5   : > { %vm3166_vm9 = vmand %vm3997_vm7, %vm621_vm14  ;;  %vm4007_vm14 = vcmp.lt.s32.totalorder %v1880_v15, 1  ;;  %v1044_v58 = vsel %vm4015_vm3, %v4014_v17, %v4013_v25 }
 0x1c6   : > { %vm4002_vm5 = vmand %vm4000_vm4, %vm4001_vm0  ;;  %v1036_v16 = vsel %vm4007_vm14, %v4006_v48, %v4005_v42  ;;  %v4065_v48 = vmov 0 }
 0x1c7   : > { %vm3176_vm6 = vmand %vm4002_vm5, %vm622_vm10  ;;  %vm4008_vm10 = vnez %v3898_v59  ;;  %vm1086_vm5 = vcmp.ge.f32.partialorder %v2699_v63, %v3147_v54  ;;  %v4055_v54 = vmov 0 }
 0x1c8   : > { %vm4010_vm12 = vmand %vm4008_vm10, %vm4009_vm1 }
 0x1c9   : > { %vm3195_vm2 = vmand %vm4010_vm12, %vm623_vm15  ;;  %vm4017_vm15 = vnez %v3924_v1 }
 0x1ca   : > { %vm4016_vm13 = vmmov %vm4007_vm14  ;;  %vm4019_vm14 = vnez %v3918_v45 }
 0x1cb   : > { %v1062_v59 = vsel %vm4016_vm13, %v1059_v6, %v1057_v41  ;;  %vm648_vm7 = vmor %vm4017_vm15, %vm3166_vm9  ;;  %vm653_vm9 = vcmp.gt.f32.partialorder %v2596_v60, 75.0 }
 0x1cc   : > { %vm4018_vm0 = vmmov %vm4016_vm13  ;;  %vm1095_vm13 = vcmp.ge.f32.partialorder %v2699_v63, %v1044_v58 }
 0x1cd   : > { %v1061_v14 = vsel %vm4018_vm0, %v1057_v41, %v1058_v9  ;;  %vm649_vm10 = vmor %vm4019_vm14, %vm3176_vm6  ;;  %vm1083_vm0 = vcmp.gt.f32.partialorder %v2699_v63, %v2956_v37 }
 0x1ce   : > { %vm4020_vm12 = vmmov %vm4015_vm3 }
 0x1cf   : > { %v1055_v56 = vsel %vm4020_vm12, %v1051_v4, %v1052_v39  ;;  %vm650_vm3 = vmor %vm3155_vm11, %vm3195_vm2 }
 0x1d0   : > { %vm4021_vm1 = vmmov %vm4020_vm12  ;;  %vm1108_vm12 = vcmp.gt.f32.partialorder %v2671_v18, %v1062_v59 }
 0x1d1   : > { %v1054_v5 = vsel %vm4021_vm1, %v1052_v39, %v1053_v7  ;;  %vm4022_vm4 = vmmov %vm4021_vm1  ;;  %v1066_v27 = vsel %vm4021_vm1, %v1064_v35, %v1065_v29  ;;  %vm657_vm1 = vcmp.gt.f32.partialorder %v2555_v57, 200.0  ;;  %v4037_v57 = vmov 0 }
 0x1d2   : > { %v1067_v62 = vsel %vm4022_vm4, %v1063_v28, %v1064_v35  ;;  %vm3251_vm11 = vmand %vm651_vm8, %vm648_vm7  ;;  %vm4027_vm8 = vcmp.gt.f32.partialorder %v2583_v30, 75.0  ;;  %vm4030_vm7 = vcmp.lt.s32.totalorder %v1880_v15, 1  ;;  %vm1112_vm6 = vcmp.gt.f32.partialorder %v2680_v46, %v1054_v5 }
 0x1d3   : > { %vm3261_vm4 = vmand %vm1083_vm0, %vm1086_vm5  ;;  %v1050_v51 = vsel %vm4030_vm7, %v1047_v2, %v1045_v31  ;;  %vm1111_vm5 = vcmp.gt.f32.partialorder %v2671_v18, %v1055_v56  ;;  %vm1102_vm14 = vcmp.gt.f32.partialorder %v2671_v18, %v1067_v62  ;;  %v4069_v35 = vmov 0 }
 0x1d4   : > { %v4026_v8 = vsel %vm3261_vm4, 4294967295, %v4025_v8  ;;  %vm3273_vm15 = vmand %vm4027_vm8, %vm649_vm10  ;;  %vm658_vm8 = vcmp.gt.f32.partialorder %v2583_v30, 200.0  ;;  %v4042_v30 = vmov 0.0  }
 0x1d5   : > { %vm3280_vm0 = vmand %vm653_vm9, %vm650_vm3  ;;  %vm4036_vm9 = vcmp.gt.f32.partialorder %v2699_v63, %v1036_v16 }
 0x1d6   : > { %vm4033_vm2 = vmmov %vm4030_vm7 }
 0x1d7   : > { %v1049_v45 = vsel %vm4033_vm2, %v1045_v31, %v1046_v24  ;;  %vm3289_vm10 = vmand %vm1108_vm12, %vm1111_vm5  ;;  %vm4039_vm2 = vcmp.gt.f32.partialorder %v2680_v46, %v1061_v14  ;;  %vm1103_vm12 = vcmp.gt.f32.partialorder %v2680_v46, %v1066_v27  ;;  %vm659_vm5 = vcmp.gt.f32.partialorder %v2596_v60, 200.0 }
 0x1d8   : > { %vm660_vm3 = vmand %vm3251_vm11, %vm657_vm1 }
 0x1d9   : > { %vm3300_vm7 = vmand %vm4036_vm9, %vm1095_vm13  ;;  %v3315_v50 = vsel %vm660_vm3, 1.0, %v4042_v30   ;;  %vm1099_vm13 = vcmp.gt.f32.partialorder %v2671_v18, %v1050_v51 }
 0x1da   : > { %v4038_v57 = vsel %vm3300_vm7, 4294967295, %v4037_v57  ;;  %vm3306_vm4 = vmand %vm4039_vm2, %vm1112_vm6  ;;  %vm1100_vm6 = vcmp.gt.f32.partialorder %v2680_v46, %v1049_v45  ;;  %v4109_v47 = vmov %v3315_v50 }
 0x1db   : > { %v4041_v55 = vsel %vm3306_vm4, 4294967295, %v4040_v55  ;;  %vm661_vm1 = vmand %vm3273_vm15, %vm658_vm8  ;;  %vm4045_vm4 = vcmp.lt.s32.totalorder %v1880_v15, 7  ;;  %vm4046_vm8 = vmmov 1  }
 0x1dc   : > { %vm662_vm9 = vmand %vm3280_vm0, %vm659_vm5  ;;  %v3321_v52 = vsel %vm661_vm1, 1.0, %v4042_v30   ;;  %v1068_v60 = vsel %vm4045_vm4, %v1065_v29, %v1063_v28  ;;  %vm4049_vm5 = vcmp.lt.s32.totalorder %v1880_v15, 1 }
 0x1dd   : > { %vm3324_vm2 = vmand %vm1099_vm13, %vm1102_vm14  ;;  %v693_v32 = vmax.f32 %v3315_v50, %v3321_v52  ;;  %v1060_v10 = vsel %vm4049_vm5, %v1058_v9, %v1059_v6  ;;  %v3346_v41 = vsel %vm662_vm9, 1.0, %v4042_v30  }
 0x1de   : > { %v4044_v11 = vsel %vm3324_vm2, 4294967295, %v4043_v11  ;;  %vm3333_vm7 = vmxor %vm660_vm3, %vm4046_vm8  ;;  %vm4054_vm3 = vnez %v3864_v0 }
 0x1df   : > { %vm3341_vm14 = vmand %vm1100_vm6, %vm1103_vm12  ;;  %v694_v9 = vmax.f32 %v693_v32, %v3346_v41 }
 0x1e0   : > { %v4051_v40 = vsel %vm3341_vm14, 4294967295, %v4050_v40  ;;  %vm3349_vm4 = vmxor %vm661_vm1, %vm4046_vm8  ;;  %vm4060_vm1 = vnez %v3867_v21  ;;  %vm4063_vm14 = vcmp.lt.s32.totalorder %v1880_v15, 7 }
 0x1e1   : > { %vm3356_vm13 = vmxor %vm4054_vm3, %vm4046_vm8  ;;  %v1056_v42 = vsel %vm4063_vm14, %v1053_v7, %v1051_v4  ;;  %695 = vmax.xlane.f32.xlu1 %v694_v9 }
 0x1e2   : > { %v4056_v54 = vsel %vm3356_vm13, 4294967295, %v4055_v54  ;;  %vm4057_vm12 = vmmov %vm4049_vm5  ;;  %vm4064_vm13 = vnez %v3869_v49 }
 0x1e3   : > { %v1048_v6 = vsel %vm4057_vm12, %v1046_v24, %v1047_v2  ;;  %vm3364_vm6 = vmxor %vm662_vm9, %vm4046_vm8  ;;  %vm1104_vm12 = vcmp.gt.f32.partialorder %v2699_v63, %v1068_v60 }
 0x1e4   : > { %vm3371_vm5 = vmxor %vm4060_vm1, %vm4046_vm8 }
 0x1e5   : > { %v4062_v3 = vsel %vm3371_vm5, 4294967295, %v4061_v3  ;;  %vm672_vm9 = vmand %vm3251_vm11, %vm3333_vm7  ;;  %vm1110_vm5 = vcmp.gt.f32.partialorder %v2699_v63, %v1060_v10  ;;  %vm1101_vm11 = vcmp.gt.f32.partialorder %v2699_v63, %v1048_v6  ;;  %v4107_v10 = vmov %v3346_v41 }
 0x1e6   : > { %vm3387_vm2 = vmxor %vm4064_vm13, %vm4046_vm8  ;;  %v3397_v37 = vsel %vm672_vm9, 1.0, %v4042_v30  ;;  %vm1113_vm8 = vcmp.gt.f32.partialorder %v2699_v63, %v1056_v42  ;;  %vm4071_vm9 = vnez %v4038_v57  ;;  %vm4077_vm13 = vnez %v4044_v11 }
 0x1e7   : > { %v4066_v48 = vsel %vm3387_vm2, 4294967295, %v4065_v48  ;;  %vm673_vm14 = vmand %vm3273_vm15, %vm3349_vm4  ;;  %vm4075_vm2 = vnez %v4041_v55 }
 0x1e8   : > { %vm674_vm7 = vmand %vm3280_vm0, %vm3364_vm6  ;;  %v3405_v16 = vsel %vm673_vm14, 1.0, %v4042_v30  ;;  %vm4072_vm14 = vnez %v3902_v23 }
 0x1e9   : > { %v681_v7 = vmax.f32 %v3397_v37, %v3405_v16  ;;  %vm3414_vm4 = vmand %vm1101_vm11, %vm1104_vm12  ;;  %v3419_v28 = vsel %vm674_vm7, 1.0, %v4042_v30  ;;  %vm4073_vm12 = vnez %v3892_v19 }
 0x1ea   : > { %v4070_v35 = vsel %vm3414_vm4, 4294967295, %v4069_v35  ;;  %vm1116_vm0 = vmand %vm1110_vm5, %vm1113_vm8  ;;  %vm4076_vm5 = vnez %v3869_v49  ;;  %vm4079_vm4 = vnez %v4051_v40  ;;  %v4108_v40 = vmov %v3321_v52 }
 0x1eb   : > { %v682_v12 = vmax.f32 %v681_v7, %v3419_v28  ;;  %vm1126_vm6 = vmand %vm4054_vm3, %vm3289_vm10  ;;  %vm4078_vm10 = vnez %v4056_v54 }
 0x1ec   : > { %vm4074_vm11 = vmand %vm4072_vm14, %vm4073_vm12  ;;  %vm4080_vm12 = vnez %v4062_v3 }
 0x1ed   : > { %vm1149_vm15 = vmand %vm4074_vm11, %vm4071_vm9  ;;  %683 = vmax.xlane.f32.xlu0 %v682_v12  ;;  %vm4081_vm9 = vnez %v4070_v35  ;;  %vm4082_vm11 = vnez %v4066_v48 }
 0x1ee   : > { %vm1127_vm8 = vmand %vm4060_vm1, %vm4075_vm2 }
 0x1ef   : > { %vm1128_vm7 = vmand %vm4076_vm5, %vm1116_vm0 }
 0x1f0   : > { %vm1132_vm3 = vmand %vm4078_vm10, %vm4077_vm13  ;;  %vm4083_vm10 = vnez %v3886_v26  ;;  %vm4084_vm13 = vnez %v4026_v8 }
 0x1f1   : > { %vm1133_vm14 = vmand %vm4080_vm12, %vm4079_vm4 }
 0x1f2   : > { %vm1134_vm1 = vmand %vm4082_vm11, %vm4081_vm9  ;;  %vm4086_vm9 = vnez %v3896_v22  ;;  %vm4087_vm11 = vnez %v3900_v20 }
 0x1f3   : > { %vm1135_vm2 = vmor %vm1126_vm6, %vm1132_vm3 }
 0x1f4   : > { %vm1136_vm0 = vmor %vm1127_vm8, %vm1133_vm14  ;;  %vm4089_vm8 = vnez %v3890_v33  ;;  %vm4090_vm14 = vnez %v3894_v38 }
 0x1f5   : > { %vm1137_vm5 = vmor %vm1128_vm7, %vm1134_vm1 }
 0x1f6   : > { %vm4085_vm4 = vmand %vm4083_vm10, %vm4084_vm13  ;;  %vm4092_vm10 = vnez %v3902_v23  ;;  %vm4093_vm13 = vnez %v3906_v34 }
 0x1f7   : > { %vm1152_vm12 = vmor %vm4085_vm4, %vm1149_vm15 }
 0x1f8   : > { %vm4088_vm3 = vmand %vm4086_vm9, %vm4087_vm11  ;;  %vm4095_vm9 = vnez %v3957_v44 }
 0x1f9   : > { %vm1159_vm6 = vmand %vm4088_vm3, %vm1135_vm2  ;;  %vm4096_vm2 = vnez %v3945_v43 }
 0x1fa   : > { %vm4091_vm1 = vmand %vm4089_vm8, %vm4090_vm14  ;;  %vm1165_vm14 = vcmp.gt.f32.partialorder %v2671_v18, 75.0 }
 0x1fb   : > { %vm1160_vm7 = vmand %vm4091_vm1, %vm1136_vm0  ;;  %vm1166_vm0 = vcmp.gt.f32.partialorder %v2680_v46, 75.0 }
 0x1fc   : > { %vm4094_vm4 = vmand %vm4092_vm10, %vm4093_vm13  ;;  %vm1167_vm10 = vcmp.gt.f32.partialorder %v2699_v63, 75.0 }
 0x1fd   : > { %vm1161_vm15 = vmand %vm4094_vm4, %vm1137_vm5  ;;  %vm1173_vm4 = vcmp.gt.f32.partialorder %v2699_v63, 200.0 }
 0x1fe   : > { %vm1162_vm11 = vmor %vm4095_vm9, %vm1159_vm6  ;;  %vm1172_vm6 = vcmp.gt.f32.partialorder %v2680_v46, 200.0 }
 0x1ff   : > { %vm1163_vm3 = vmor %vm4096_vm2, %vm1160_vm7 }
 0x200   : > { %vm1164_vm8 = vmor %vm1152_vm12, %vm1161_vm15  ;;  %vm1171_vm12 = vcmp.gt.f32.partialorder %v2671_v18, 200.0 }
 0x201   : > { %vm3477_vm1 = vmand %vm1165_vm14, %vm1162_vm11  ;;  %vm4103_vm11 = vmmov 1  }
 0x202   : > { %vm3482_vm13 = vmand %vm1166_vm0, %vm1163_vm3 }
 0x203   : > { %vm3486_vm5 = vmand %vm1167_vm10, %vm1164_vm8 }
 0x204   : > { %vm1174_vm7 = vmand %vm3477_vm1, %vm1171_vm12 }
 0x205   : > { %vm1175_vm15 = vmand %vm3482_vm13, %vm1172_vm6  ;;  %v3498_v26 = vsel %vm1174_vm7, 1.0, %v4042_v30  }
 0x206   : > { %vm1176_vm9 = vmand %vm3486_vm5, %vm1173_vm4  ;;  %v3503_v33 = vsel %vm1175_vm15, 1.0, %v4042_v30   ;;  %v4106_v36 = vmov %v3498_v26 }
 0x207   : > { %vm1183_vm2 = vmxor %vm1174_vm7, %vm4103_vm11  ;;  %v1207_v18 = vmax.f32 %v3498_v26, %v3503_v33  ;;  %v3510_v46 = vsel %vm1176_vm9, 1.0, %v4042_v30   ;;  %v4105_v32 = vmov %v3503_v33 }
 0x208   : > { %vm1184_vm3 = vmxor %vm1175_vm15, %vm4103_vm11  ;;  %v4104_v60 = vmov %v3510_v46 }
 0x209   : > { %vm1185_vm8 = vmxor %vm1176_vm9, %vm4103_vm11  ;;  %v1208_v63 = vmax.f32 %v1207_v18, %v3510_v46 }
 0x20a   : > { %vm1186_vm14 = vmand %vm3477_vm1, %vm1183_vm2 }
 0x20b   : > { %vm1187_vm0 = vmand %vm3482_vm13, %vm1184_vm3  ;;  %v3519_v19 = vsel %vm1186_vm14, 1.0, %v4042_v30 }
 0x20c   : > { %vm1188_vm10 = vmand %vm3486_vm5, %vm1185_vm8  ;;  %v3524_v38 = vsel %vm1187_vm0, 1.0, %v4042_v30 }
 0x20d   : > { %v1195_v22 = vmax.f32 %v3519_v19, %v3524_v38  ;;  %v3529_v20 = vsel %vm1188_vm10, 1.0, %v4042_v30 }
 0x20f   : > { %v1196_v23 = vmax.f32 %v1195_v22, %v3529_v20 }
 0x211   : > { %1197 = vmax.xlane.f32.xlu0 %v1196_v23 }
 0x215   : > { %1209 = vmax.xlane.f32.xlu0 %v1208_v63 }
 0x26e   : > { %v696_v34 = vpop.xlane.xlu1 %695 }
 0x26f   : > { %v697_v43 = vrot.slane %v696_v34, 4 }
 0x271   : > { %v698_v44 = vmax.f32 %v696_v34, %v697_v43 }
 0x273   : > { %v699_v25 = vrot.slane %v698_v44, 2 }
 0x275   : > { %v700_v59 = vmax.f32 %v698_v44, %v699_v25 }
 0x277   : > { %v701_v14 = vrot.slane %v700_v59, 1 }
 0x279   : > { %v702_v56 = vmax.f32 %v700_v59, %v701_v14 }
 0x27a   : > { %v684_v17 = vpop.xlane.xlu0 %683 }
 0x27b   : > { %v685_v58 = vrot.slane %v684_v17, 4 }
 0x27d   : > { %v686_v4 = vmax.f32 %v684_v17, %v685_v58 }
 0x27f   : > { %v687_v29 = vrot.slane %v686_v4, 2 }
 0x281   : > { %v688_v2 = vmax.f32 %v686_v4, %v687_v29 }
 0x283   : > { %v689_v31 = vrot.slane %v688_v2, 1 }
 0x285   : > { %v690_v24 = vmax.f32 %v688_v2, %v689_v31 }
 0x287   : > { %1583 = vpush %v690_v24 }
 0x288   : > { %1585 = vpush %v702_v56 }
 0x29e   : > { %v1198_v5 = vpop.xlane.xlu0 %1197 }
 0x29f   : > { %v1199_v62 = vrot.slane %v1198_v5, 4 }
 0x2a1   : > { %v1200_v61 = vmax.f32 %v1198_v5, %v1199_v62 }
 0x2a2   : > { %v1210_v27 = vpop.xlane.xlu0 %1209 }
 0x2a3   : > { %v1201_v8 = vrot.slane %v1200_v61, 2  ;;  %v1211_v1 = vrot.slane %v1210_v27, 4 }
 0x2a5   : > { %v1212_v51 = vmax.f32 %v1210_v27, %v1211_v1  ;;  %v1202_v53 = vmax.f32 %v1200_v61, %v1201_v8 }
 0x2a7   : > { %v1213_v45 = vrot.slane %v1212_v51, 2  ;;  %v1203_v13 = vrot.slane %v1202_v53, 1 }
 0x2a9   : > { %v1214_v57 = vmax.f32 %v1212_v51, %v1213_v45  ;;  %v1204_v55 = vmax.f32 %v1202_v53, %v1203_v13 }
 0x2ab   : > { %1587 = vpush %v1204_v55  ;;  %v1215_v30 = vrot.slane %v1214_v57, 1 }
 0x2ad   : > { %v1216_v11 = vmax.f32 %v1214_v57, %v1215_v30 }
 0x2af   : > { %1589 = vpush %v1216_v11 }
 0x2b8   : > { %s1584_s24 = spop %1583 }
 0x2b9   : > { %s1586_s25 = spop %1585  ;;  %p692_p4 = scmp.gt.f32.partialorder %s1584_s24, 0.0 }
 0x2ba   : > { %p704_p5 = scmp.gt.f32.partialorder %s1586_s25, 0.0 }
 0x2bc   : > { %p705_p6 = pnand %p704_p5, %p692_p4 }
 0x2be   : > { %p706_p10 = pneg %p705_p6 }
 0x2dc   : > { %s1588_s26 = spop %1587 }
 0x2dd   : > { %p1206_p7 = scmp.gt.f32.partialorder %s1588_s26, 0.0 }
 0x2e0   : > { %s1590_s27 = spop %1589 }
 0x2e1   : > { %p1218_p8 = scmp.gt.f32.partialorder %s1590_s27, 0.0 }
 0x2e3   : > { %p1219_p9 = pnand %p1218_p8, %p1206_p7 }
 0x2e5   : > { %p1220_p11 = pneg %p1219_p9 }
 0x2e7   : > { %p1221_p12 = por %p1220_p11, %p706_p10 }
 0x2e8   : > { %s3568_s28 = smov (%p1221_p12), 0  }
 0x2e9   : > { %1503 = sbr.rel (!%p1221_p12) target bundleno = 1266 (0x4f2), region = 66 }
 0x2f0 LB: >> { %v1236_v54 = vrot.slane %v1797_v50, 7  ;;  %v1238_v6 = vrot.slane %v1789_v41, 7  ;;  %v1242_v9 = vrot.slane %v1797_v50, 1  ;;  %v1243_v39 = vrot.slane %v1793_v52, 1  ;;  %s1831_s29 = smov 1   ;;  %s1832_s30 = smov 127   ;;  %s1801_s28 = sphi %s3568_s28, %s1434_s28   ;;  %v1797_v50 = vphi %v3315_v50, %v4139_v50   ;;  %v1793_v52 = vphi %v3321_v52, %v4138_v52   ;;  %v1789_v41 = vphi %v3346_v41, %v4137_v41   ;;  %v1785_v26 = vphi %v3498_v26, %v4136_v26   ;;  %v1781_v33 = vphi %v3503_v33, %v4135_v33   ;;  %v1777_v46 = vphi %v3510_v46, %v4134_v46  }
 0x2f1   : >> { %v1237_v3 = vrot.slane %v1793_v52, 7  ;;  %v1244_v42 = vrot.slane %v1789_v41, 1  ;;  %vm4110_vm1 = vcmp.lt.s32.totalorder %v1880_v15, 1  ;;  %vm4111_vm13 = vcmp.lt.s32.totalorder %v1880_v15, 7  ;;  %s1434_s28 = sadd.s32 1, %s1801_s28  }
 0x2f2   : >> { %v1241_v48 = vsel %vm4110_vm1, %v1238_v6, %v1236_v54  ;;  %v1246_v7 = vsel %vm4111_vm13, %v1242_v9, %v1243_v39  ;;  %vm4112_vm5 = vmmov %vm4110_vm1  ;;  %v1320_v63 = vrot.slane %v1785_v26, 7  ;;  %v1321_v22 = vrot.slane %v1781_v33, 7  ;;  %p1231_p0 = scmp.lt.s32.totalorder %s1434_s28, 256 }
 0x2f3   : >> { %v1248_v35 = vmax.f32 %v1241_v48, %v1246_v7  ;;  %v1239_v12 = vsel %vm4112_vm5, %v1237_v3, %v1238_v6  ;;  %vm4113_vm12 = vmmov %vm4111_vm13  ;;  %v1327_v43 = vrot.slane %v1781_v33, 1  ;;  %v1328_v44 = vrot.slane %v1777_v46, 1 }
 0x2f4   : >> { %v1247_v0 = vsel %vm4113_vm12, %v1244_v42, %v1242_v9  ;;  %vm4114_vm6 = vmmov %vm4110_vm1  ;;  %v1322_v17 = vrot.slane %v1777_v46, 7  ;;  %v1326_v58 = vrot.slane %v1785_v26, 1 }
 0x2f5   : >> { %v1240_v21 = vsel %vm4114_vm6, %v1236_v54, %v1237_v3  ;;  %v1250_v49 = vmax.f32 %v1239_v12, %v1247_v0  ;;  %vm4115_vm7 = vmmov %vm4113_vm12  ;;  %v1251_v23 = vmax.f32 %v1797_v50, %v1248_v35 }
 0x2f6   : >> { %v1245_v18 = vsel %vm4115_vm7, %v1243_v39, %v1244_v42  ;;  %vm4116_vm4 = vmmov %vm4110_vm1 }
 0x2f7   : >> { %v1249_v34 = vmax.f32 %v1240_v21, %v1245_v18  ;;  %v1253_v25 = vmax.f32 %v1789_v41, %v1250_v49  ;;  %1254 = vrot.lane.b32.xlu0 %v1251_v23, %s1831_s29  ;;  %v1325_v59 = vsel %vm4116_vm4, %v1322_v17, %v1320_v63  ;;  %vm4117_vm15 = vmmov %vm4115_vm7 }
 0x2f8   : >> { %v1330_v29 = vsel %vm4117_vm15, %v1326_v58, %v1327_v43  ;;  %vm4118_vm9 = vmmov %vm4110_vm1 }
 0x2f9   : >> { %v1252_v4 = vmax.f32 %v1793_v52, %v1249_v34  ;;  %1258 = vrot.lane.b32.xlu1 %v1253_v25, %s1831_s29  ;;  %v1324_v2 = vsel %vm4118_vm9, %v1320_v63, %v1321_v22  ;;  %vm4119_vm11 = vmmov %vm4115_vm7  ;;  %v1332_v31 = vmax.f32 %v1325_v59, %v1330_v29 }
 0x2fa   : >> { %v1329_v14 = vsel %vm4119_vm11, %v1327_v43, %v1328_v44  ;;  %vm4120_vm2 = vmmov %vm4110_vm1 }
 0x2fb   : >> { %1256 = vrot.lane.b32.xlu0 %v1252_v4, %s1831_s29  ;;  %v1333_v24 = vmax.f32 %v1324_v2, %v1329_v14  ;;  %v1323_v56 = vsel %vm4120_vm2, %v1321_v22, %v1322_v17  ;;  %vm4121_vm3 = vmmov %vm4115_vm7  ;;  %v1335_v62 = vmax.f32 %v1785_v26, %v1332_v31 }
 0x2fc   : >> { %v1331_v5 = vsel %vm4121_vm3, %v1328_v44, %v1326_v58  ;;  %vm4122_vm8 = vmmov %vm4110_vm1 }
 0x2fd   : >> { %1260 = vrot.lane.b32.xlu1 %v1251_v23, %s1832_s30  ;;  %v1334_v61 = vmax.f32 %v1323_v56, %v1331_v5  ;;  %v1336_v27 = vmax.f32 %v1781_v33, %v1333_v24  ;;  %vm4123_vm14 = vmmov %vm4121_vm3 }
 0x2fe   : >> { %vm4124_vm0 = vmmov %vm4121_vm3 }
 0x2ff   : >> { %1262 = vrot.lane.b32.xlu0 %v1252_v4, %s1832_s30  ;;  %v1337_v8 = vmax.f32 %v1777_v46, %v1334_v61  ;;  %vm4125_vm10 = vmmov %vm4110_vm1 }
 0x300   : >> { %vm4126_vm1 = vmmov %vm4124_vm0 }
 0x301   : >> { %1264 = vrot.lane.b32.xlu1 %v1253_v25, %s1832_s30  ;;  %vm4127_vm13 = vmmov %vm4120_vm2 }
 0x302   : >> { %vm4128_vm5 = vmmov %vm4120_vm2 }
 0x303   : >> { %1338 = vrot.lane.b32.xlu0 %v1335_v62, %s1831_s29  ;;  %vm4129_vm12 = vmmov %vm4124_vm0 }
 0x304   : >> { %vm4130_vm6 = vmmov %vm4120_vm2 }
 0x305   : >> { %1340 = vrot.lane.b32.xlu1 %v1336_v27, %s1831_s29  ;;  %vm4131_vm7 = vmmov %vm4124_vm0 }
 0x306   : >> { %vm4132_vm4 = vmmov %vm4120_vm2 }
 0x307   : >> { %1342 = vrot.lane.b32.xlu0 %v1337_v8, %s1831_s29  ;;  %vm4133_vm15 = vmmov %vm4124_vm0 }
 0x309   : >> { %1344 = vrot.lane.b32.xlu1 %v1335_v62, %s1832_s30 }
 0x30b   : >> { %1346 = vrot.lane.b32.xlu0 %v1336_v27, %s1832_s30 }
 0x30d   : >> { %1348 = vrot.lane.b32.xlu1 %v1337_v8, %s1832_s30 }
 0x369   : >> { %v1255_v1 = vpop.permute.xlu0 %1254 }
 0x36b   : >> { %v1259_v51 = vpop.permute.xlu1 %1258 }
 0x36d   : >> { %v1257_v53 = vpop.permute.xlu0 %1256 }
 0x36f   : >> { %v1261_v45 = vpop.permute.xlu1 %1260 }
 0x370   : >> { %v1266_v13 = vmax.f32 %v1255_v1, %v1261_v45 }
 0x371   : >> { %v1263_v55 = vpop.permute.xlu0 %1262 }
 0x372   : >> { %v1269_v57 = vmax.f32 %v1251_v23, %v1266_v13  ;;  %v1267_v30 = vmax.f32 %v1257_v53, %v1263_v55 }
 0x373   : >> { %v1265_v11 = vpop.permute.xlu1 %1264 }
 0x374   : >> { %v1272_v60 = vmul.f32 %v3397_v37, %v1269_v57  ;;  %v1268_v32 = vmax.f32 %v1259_v51, %v1265_v11  ;;  %v1270_v36 = vmax.f32 %v1252_v4, %v1267_v30 }
 0x375   : >> { %v1339_v40 = vpop.permute.xlu0 %1338 }
 0x376   : >> { %v1271_v10 = vmax.f32 %v1253_v25, %v1268_v32  ;;  %v3647_v47 = vmax.f32 %v1797_v50, %v1272_v60  ;;  %v1273_v54 = vmul.f32 %v3405_v16, %v1270_v36 }
 0x377   : >> { %v1341_v6 = vpop.permute.xlu1 %1340 }
 0x378   : >> { %v1274_v9 = vmul.f32 %v3419_v28, %v1271_v10  ;;  %v3652_v39 = vmax.f32 %v1793_v52, %v1273_v54  ;;  %v1278_v7 = vrot.slane %v3647_v47, 7  ;;  %v1284_v0 = vrot.slane %v3647_v47, 1 }
 0x379   : >> { %v1343_v42 = vpop.permute.xlu0 %1342 }
 0x37a   : >> { %v3655_v3 = vmax.f32 %v1789_v41, %v1274_v9  ;;  %v1279_v35 = vrot.slane %v3652_v39, 7  ;;  %v1285_v12 = vrot.slane %v3652_v39, 1 }
 0x37b   : >> { %v1345_v48 = vpop.permute.xlu1 %1344 }
 0x37c   : >> { %v1350_v21 = vmax.f32 %v1339_v40, %v1345_v48  ;;  %v1286_v49 = vrot.slane %v3655_v3, 1  ;;  %v1280_v18 = vrot.slane %v3655_v3, 7  ;;  %v1282_v63 = vsel %vm4122_vm8, %v1278_v7, %v1279_v35 }
 0x37d   : >> { %v1288_v22 = vsel %vm4123_vm14, %v1284_v0, %v1285_v12  ;;  %v1347_v34 = vpop.permute.xlu0 %1346 }
 0x37e   : >> { %v1353_v23 = vmax.f32 %v1335_v62, %v1350_v21  ;;  %v1287_v43 = vsel %vm4124_vm0, %v1285_v12, %v1286_v49  ;;  %v1283_v44 = vsel %vm4125_vm10, %v1280_v18, %v1278_v7  ;;  %v1351_v17 = vmax.f32 %v1341_v6, %v1347_v34 }
 0x37f   : >> { %v1349_v25 = vpop.permute.xlu1 %1348  ;;  %v1291_v58 = vmax.f32 %v1282_v63, %v1287_v43  ;;  %v1290_v4 = vmax.f32 %v1283_v44, %v1288_v22  ;;  %v1281_v40 = vsel %vm4130_vm6, %v1279_v35, %v1280_v18  ;;  %v1289_v54 = vsel %vm4131_vm7, %v1286_v49, %v1284_v0 }
 0x380   : >> { %v1356_v59 = vmul.f32 %v3519_v19, %v1353_v23  ;;  %v1352_v29 = vmax.f32 %v1343_v42, %v1349_v25  ;;  %v1354_v2 = vmax.f32 %v1336_v27, %v1351_v17  ;;  %v1292_v6 = vmax.f32 %v1281_v40, %v1289_v54 }
 0x381   : >> { %v1294_v14 = vmax.f32 %v3652_v39, %v1291_v58  ;;  %v1293_v31 = vmax.f32 %v3647_v47, %v1290_v4 }
 0x382   : >> { %v1355_v24 = vmax.f32 %v1337_v8, %v1352_v29  ;;  %v3675_v56 = vmax.f32 %v1785_v26, %v1356_v59  ;;  %v1357_v5 = vmul.f32 %v3524_v38, %v1354_v2  ;;  %v1295_v48 = vmax.f32 %v3655_v3, %v1292_v6 }
 0x383   : >> { %1298 = vrot.lane.b32.xlu1 %v1294_v14, %s1831_s29  ;;  %1296 = vrot.lane.b32.xlu0 %v1293_v31, %s1831_s29 }
 0x384   : >> { %v1358_v62 = vmul.f32 %v3529_v20, %v1355_v24  ;;  %v3682_v61 = vmax.f32 %v1781_v33, %v1357_v5  ;;  %v1362_v8 = vrot.slane %v3675_v56, 7  ;;  %v1368_v1 = vrot.slane %v3675_v56, 1 }
 0x386   : >> { %v3685_v27 = vmax.f32 %v1777_v46, %v1358_v62  ;;  %v1369_v51 = vrot.slane %v3682_v61, 1  ;;  %v1363_v53 = vrot.slane %v3682_v61, 7 }
 0x387   : >> { %1304 = vrot.lane.b32.xlu1 %v1294_v14, %s1832_s30  ;;  %1302 = vrot.lane.b32.xlu0 %v1293_v31, %s1832_s30 }
 0x388   : >> { %v1364_v45 = vrot.slane %v3685_v27, 7  ;;  %v1370_v13 = vrot.slane %v3685_v27, 1  ;;  %v1372_v57 = vsel %vm4126_vm1, %v1368_v1, %v1369_v51  ;;  %v1366_v55 = vsel %vm4127_vm13, %v1362_v8, %v1363_v53 }
 0x38a   : >> { %v1367_v30 = vsel %vm4128_vm5, %v1364_v45, %v1362_v8  ;;  %v1371_v11 = vsel %vm4129_vm12, %v1369_v51, %v1370_v13  ;;  %v1365_v9 = vsel %vm4132_vm4, %v1363_v53, %v1364_v45  ;;  %v1373_v42 = vsel %vm4133_vm15, %v1370_v13, %v1368_v1 }
 0x38b   : >> { %v1374_v60 = vmax.f32 %v1367_v30, %v1372_v57  ;;  %v1375_v32 = vmax.f32 %v1366_v55, %v1371_v11  ;;  %v1376_v7 = vmax.f32 %v1365_v9, %v1373_v42 }
 0x38d   : >> { %v1377_v36 = vmax.f32 %v3675_v56, %v1374_v60  ;;  %v1378_v10 = vmax.f32 %v3682_v61, %v1375_v32  ;;  %v1379_v35 = vmax.f32 %v3685_v27, %v1376_v7 }
 0x38f   : >> { %1380 = vrot.lane.b32.xlu0 %v1377_v36, %s1831_s29  ;;  %1382 = vrot.lane.b32.xlu1 %v1378_v10, %s1831_s29 }
 0x393   : >> { %1386 = vrot.lane.b32.xlu0 %v1377_v36, %s1832_s30  ;;  %1388 = vrot.lane.b32.xlu1 %v1378_v10, %s1832_s30 }
 0x397   : >> { %1300 = vrot.lane.b32.xlu0 %v1295_v48, %s1831_s29  ;;  %1306 = vrot.lane.b32.xlu1 %v1295_v48, %s1832_s30 }
 0x39b   : >> { %1390 = vrot.lane.b32.xlu1 %v1379_v35, %s1832_s30  ;;  %1384 = vrot.lane.b32.xlu0 %v1379_v35, %s1831_s29 }
 0x3f5   : >> { %v1299_v12 = vpop.permute.xlu1 %1298  ;;  %v1297_v0 = vpop.permute.xlu0 %1296 }
 0x3f9   : >> { %v1305_v21 = vpop.permute.xlu1 %1304  ;;  %v1303_v49 = vpop.permute.xlu0 %1302 }
 0x3fa   : >> { %v1309_v18 = vmax.f32 %v1299_v12, %v1305_v21  ;;  %v1308_v63 = vmax.f32 %v1297_v0, %v1303_v49 }
 0x3fc   : >> { %v1312_v22 = vmax.f32 %v1294_v14, %v1309_v18  ;;  %v1311_v23 = vmax.f32 %v1293_v31, %v1308_v63 }
 0x3fe   : >> { %v1315_v44 = vmul.f32 %v3405_v16, %v1312_v22  ;;  %v1314_v25 = vmul.f32 %v3397_v37, %v1311_v23 }
 0x400   : >> { %v3726_v24 = vmax.f32 %v3652_v39, %v1315_v44   ;;  %v3729_v5 = vmax.f32 %v3647_v47, %v1314_v25  }
 0x401   : >> { %v1383_v34 = vpop.permute.xlu1 %1382  ;;  %v1381_v43 = vpop.permute.xlu0 %1380 }
 0x402   : >> { %v1404_v13 = vsub.f32 %v3729_v5, %v1797_v50  ;;  %v1405_v39 = vsub.f32 %v3726_v24, %v1793_v52 }
 0x404   : >> { %v1407_v32 = vmax.f32 %v1404_v13, %v1405_v39 }
 0x405   : >> { %v1389_v17 = vpop.permute.xlu1 %1388  ;;  %v1387_v58 = vpop.permute.xlu0 %1386 }
 0x406   : >> { %v1393_v4 = vmax.f32 %v1383_v34, %v1389_v17  ;;  %v1392_v59 = vmax.f32 %v1381_v43, %v1387_v58 }
 0x408   : >> { %v1396_v29 = vmax.f32 %v1378_v10, %v1393_v4  ;;  %v1395_v2 = vmax.f32 %v1377_v36, %v1392_v59 }
 0x409   : >> { %v1307_v14 = vpop.permute.xlu1 %1306  ;;  %v1301_v31 = vpop.permute.xlu0 %1300 }
 0x40a   : >> { %v1399_v62 = vmul.f32 %v3524_v38, %v1396_v29  ;;  %v1398_v8 = vmul.f32 %v3519_v19, %v1395_v2  ;;  %v1310_v1 = vmax.f32 %v1301_v31, %v1307_v14 }
 0x40c   : >> { %v1313_v51 = vmax.f32 %v1295_v48, %v1310_v1  ;;  %v1402_v57 = vmax.f32 %v3682_v61, %v1399_v62   ;;  %v1401_v47 = vmax.f32 %v3675_v56, %v1398_v8  }
 0x40d   : >> { %v1391_v53 = vpop.permute.xlu1 %1390  ;;  %v1385_v45 = vpop.permute.xlu0 %1384 }
 0x40e   : >> { %v1316_v55 = vmul.f32 %v3419_v28, %v1313_v51  ;;  %v1394_v30 = vmax.f32 %v1385_v45, %v1391_v53  ;;  %v1418_v50 = vsub.f32 %v1401_v47, %v1785_v26  ;;  %v1419_v52 = vsub.f32 %v1402_v57, %v1781_v33 }
 0x410   : >> { %v1319_v11 = vmax.f32 %v3655_v3, %v1316_v55   ;;  %v1397_v60 = vmax.f32 %v1379_v35, %v1394_v30  ;;  %v1421_v54 = vmax.f32 %v1418_v50, %v1419_v52  ;;  %v4138_v52 = vmov %v3726_v24 }
 0x411   : >> { %v4139_v50 = vmov %v3729_v5 }
 0x412   : >> { %v1400_v36 = vmul.f32 %v3529_v20, %v1397_v60  ;;  %v1406_v10 = vsub.f32 %v1319_v11, %v1789_v41 }
 0x414   : >> { %v1403_v61 = vmax.f32 %v3685_v27, %v1400_v36   ;;  %v1408_v40 = vmax.f32 %v1407_v32, %v1406_v10 }
 0x416   : >> { %1409 = vmax.xlane.f32.xlu0 %v1408_v40  ;;  %v1420_v56 = vsub.f32 %v1403_v61, %v1777_v46  ;;  %v4134_v46 = vmov %v1403_v61 }
 0x418   : >> { %v1422_v6 = vmax.f32 %v1421_v54, %v1420_v56 }
 0x41a   : >> { %1423 = vmax.xlane.f32.xlu1 %v1422_v6 }
 0x4a3   : >> { %v1410_v3 = vpop.xlane.xlu0 %1409 }
 0x4a4   : >> { %v1411_v9 = vrot.slane %v1410_v3, 4 }
 0x4a6   : >> { %v1412_v42 = vmax.f32 %v1410_v3, %v1411_v9 }
 0x4a7   : >> { %v1424_v48 = vpop.xlane.xlu1 %1423 }
 0x4a8   : >> { %v1413_v7 = vrot.slane %v1412_v42, 2  ;;  %v1425_v41 = vrot.slane %v1424_v48, 4 }
 0x4aa   : >> { %v1426_v35 = vmax.f32 %v1424_v48, %v1425_v41  ;;  %v1414_v26 = vmax.f32 %v1412_v42, %v1413_v7  ;;  %v4137_v41 = vmov %v1319_v11 }
 0x4ac   : >> { %v1427_v12 = vrot.slane %v1426_v35, 2  ;;  %v1415_v33 = vrot.slane %v1414_v26, 1 }
 0x4ae   : >> { %v1428_v0 = vmax.f32 %v1426_v35, %v1427_v12  ;;  %v1416_v27 = vmax.f32 %v1414_v26, %v1415_v33  ;;  %v4135_v33 = vmov %v1402_v57  ;;  %v4136_v26 = vmov %v1401_v47 }
 0x4b0   : >> { %1591 = vpush %v1416_v27  ;;  %v1429_v21 = vrot.slane %v1428_v0, 1 }
 0x4b2   : >> { %v1430_v49 = vmax.f32 %v1428_v0, %v1429_v21 }
 0x4b4   : >> { %1593 = vpush %v1430_v49 }
 0x4e1   : >> { %s1592_s3 = spop %1591 }
 0x4e5   : >> { %s1594_s4 = spop %1593 }
 0x4e6   : >> { %s1432_s5 = smax.f32 %s1594_s4, %s1592_s3 }
 0x4e7   : >> { %p1433_p13 = scmp.gt.f32.partialorder %s1432_s5, 0.0 }
 0x4e9   : >> { %p1232_p1 = pnand %p1433_p13, %p1231_p0 }
 0x4ea   : > { %v4140_v60 = vmov (%p1232_p1), %v1403_v61  ;;  %v4141_v32 = vmov (%p1232_p1), %v1402_v57  ;;  %v4142_v36 = vmov (%p1232_p1), %v1401_v47  ;;  %v4143_v10 = vmov (%p1232_p1), %v1319_v11 }
 0x4eb   : > { %1235 = sbr.rel (!%p1232_p1) target bundleno = 752 (0x2f0), region = 72  ;;  %v4144_v40 = vmov (%p1232_p1), %v3726_v24  ;;  %v4145_v47 = vmov (%p1232_p1), %v3729_v5 }
 0x4f2 PF: > { %v1435_v15 = vsub.f32 %v1825_v47, %v1813_v36  ;;  %v1436_v37 = vsub.f32 %v1821_v40, %v1809_v32  ;;  %v1437_v16 = vsub.f32 %v1817_v10, %v1805_v60  ;;  %v1825_v47 = vphi %v4109_v47, %v4145_v47   ;;  %v1821_v40 = vphi %v4108_v40, %v4144_v40   ;;  %v1817_v10 = vphi %v4107_v10, %v4143_v10   ;;  %v1813_v36 = vphi %v4106_v36, %v4142_v36   ;;  %v1809_v32 = vphi %v4105_v32, %v4141_v32   ;;  %v1805_v60 = vphi %v4104_v60, %v4140_v60  }
 0x4f4   : > { %v1438_v28 = vand.u32 2147483647, %v1435_v15  ;;  %v1439_v46 = vand.u32 2147483647, %v1436_v37  ;;  %v1440_v19 = vand.u32 2147483647, %v1437_v16 }
 0x4f6   : > { %v1441_v38 = vadd.f32 %v1439_v46, %v1438_v28 }
 0x4f8   : > { %v1442_v20 = vadd.f32 %v1441_v38, %v1440_v19 }
 0x4fa   : > { %1443 = vadd.xlane.f32.xlu0 %v1442_v20 }
 0x587   : > { %v1444_v18 = vpop.xlane.xlu0 %1443 }
 0x588   : > { %v1445_v63 = vrot.slane %v1444_v18, 4 }
 0x58a   : > { %v1446_v22 = vadd.f32 %v1445_v63, %v1444_v18 }
 0x58c   : > { %v1447_v23 = vrot.slane %v1446_v22, 2 }
 0x58e   : > { %v1448_v34 = vadd.f32 %v1447_v23, %v1446_v22 }
 0x590   : > { %v1449_v43 = vrot.slane %v1448_v34, 1 }
 0x592   : > { %v1450_v44 = vadd.f32 %v1449_v43, %v1448_v34 }
 0x594   : > { %1595 = vpush %v1450_v44 }
 0x5c5   : > { %s1596_s6 = spop %1595 }
 0x5c6   : > { %v1452_v25 = vstv %s1596_s6 }
 0x5c7   : > { %1453 = vst [vmem:[%s1859_s15] sm:$0xff] %v1452_v25 }
 0x5c8 PF: > { %s12_s9 = sadd.s32 1, %s1773_s9  }
 0x5c9   : > { %p9_p2 = scmp.ge.s32.totalorder %s12_s9, 4  }
 0x5cb   :  { %11 = sbr.rel (!%p9_p2) target bundleno = 1 (0x1), region = 83 }

</bundles_post_ra>
